<compile_context>
chip_gen: v6e
topology: v6e:2x2x1
jax: 0.10.0
libtpu: 0.0.40
codegen_flags: <defaults>
</compile_context>

<pallas_src>
import numpy as np

import jax
import jax.numpy as jnp
from jax.experimental import pallas as pl
from jax.experimental.pallas import tpu as pltpu


# ---------------------------------------------------------------------------
# lane-shift helper (resolves pltpu.roll's rotation convention once, at init)
# ---------------------------------------------------------------------------

_LANE_SHIFT_FN = None


def _lane_shift_fn():
    """Returns f(x, s) with f(x, s)[..., p] == x[..., (p + s) % n]."""
    global _LANE_SHIFT_FN
    if _LANE_SHIFT_FN is not None:
        return _LANE_SHIFT_FN
    try:
        def _probe(x_ref, o_ref):
            o_ref[...] = pltpu.roll(x_ref[...], 1, 1)

        xp = jnp.tile(jnp.arange(128, dtype=jnp.float32)[None, :], (8, 1))
        yp = pl.pallas_call(
            _probe, out_shape=jax.ShapeDtypeStruct((8, 128), jnp.float32))(xp)
        # np.roll convention: roll(x, 1)[..., 0] == x[..., -1] == 127 => shift = -s
        sign = -1 if int(yp[0, 0]) == 127 else 1

        def fn(x, s):
            n = x.shape[-1]
            return pltpu.roll(x, (sign * s) % n, x.ndim - 1)
    except Exception:
        # TODO(synk): pltpu.roll probe failed on this jax version; jnp.roll
        # lowers to the same lane-rotate relayout (slice + concat).
        def fn(x, s):
            return jnp.roll(x, -s, axis=-1)

    _LANE_SHIFT_FN = fn
    return fn


# ---------------------------------------------------------------------------
# Pallas kernel
# ---------------------------------------------------------------------------

_TAPS_3x3 = tuple((oy, ox) for oy in (-1, 0, 1) for ox in (-1, 0, 1))


def _tap_index(oy, ox):
    return (oy + 1) * 3 + (ox + 1)


def _make_rfem2_kernel(W, c_out, cpad2, shift_lanes):
    def prelu(v, a):
        return jnp.where(v >= 0, v, a * v)

    def im2col9(v, masks):
        # v: (Cpad, L) f32 with Cpad a multiple of 8 -> every tap block is an
        # aligned sublane copy; single cast to bf16 at the end.
        cols = []
        for oy, ox in _TAPS_3x3:
            s = oy * W + ox
            if s == 0:
                cols.append(v)
            else:
                m = masks[_tap_index(oy, ox)][None, :]        # (1, L) 0/1
                cols.append(shift_lanes(v, s) * m)            # zero halo
        return jnp.concatenate(cols, axis=0).astype(jnp.bfloat16)

    def mm(w_ref, rhs_bf16, b_ref):
        # w_ref: bf16 (rows, K) | rhs: bf16 (K, L) | f32 accumulate + bias.
        y = jax.lax.dot_general(
            w_ref[...], rhs_bf16,
            dimension_numbers=(((1,), (0,)), ((), ())),
            preferred_element_type=jnp.float32)
        return y + b_ref[...]

    def kernel(alpha_ref, x_ref, masks_ref,
               w_sp_ref, b_sp_ref, w11_ref, b11_ref, wc1_ref, bc1_ref,
               bns_ref, bnb_ref,
               out_ref, diva_ref, multf_ref):
        a = alpha_ref[0]                       # PReLU slope (num_parameters=1)
        x = x_ref[...]                         # (Cin_pad, L) f32, lane-dense
        masks = masks_ref[...]                 # (9, L) 0/1 f32 border masks

        # PReLU + ONE shared 9-tap im2col; stacked weight emits
        # oam = [con_3_3 ; conv_3_1 ; conv_1_3] in a single MXU matmul.
        x_p = prelu(x, a)
        oam = mm(w_sp_ref, im2col9(x_p, masks), b_sp_ref)      # (3*Cout, L)

        # TODO(synk): DiVA_attention undefined in source -> identity pass-through.
        diva_ref[...] = oam.astype(diva_ref.dtype)

        # Stacked 1x1: rows [0:2*Cout] = confusion (cat), rows [2*Cout:] =
        # confusion1 (multf) -> one matmul over the shared RHS.
        oam_p = prelu(oam, a).astype(jnp.bfloat16)
        y11 = mm(w11_ref, oam_p, b11_ref)                      # (3*Cout, L)
        multf_ref[...] = y11[2 * c_out:].astype(multf_ref.dtype)
        cat = y11[:2 * c_out]                                  # (2*Cout, L)

        # conv1 (3x3) -> folded eval-BatchNorm affine -> +x residual.
        cat_p = prelu(cat, a)
        if cpad2 > 2 * c_out:
            cat_p = jnp.concatenate(
                [cat_p, jnp.zeros((cpad2 - 2 * c_out, cat_p.shape[1]),
                                  cat_p.dtype)], axis=0)
        c1 = mm(wc1_ref, im2col9(cat_p, masks), bc1_ref)       # (Cout, L)
        out_ref[...] = (bns_ref[...] * c1 + bnb_ref[...]
                        + x[:c_out]).astype(out_ref.dtype)

    return kernel


# ---------------------------------------------------------------------------
# host-side helpers (masks, weight-norm params, packing)
# ---------------------------------------------------------------------------

def _round_up(v, m):
    return ((v + m - 1) // m) * m


def _border_masks(H, W):
    """(9, H*W) 0/1 validity masks for the 3x3 tap offsets (zero-pad 'same')."""
    hh, ww = np.meshgrid(np.arange(H), np.arange(W), indexing="ij")
    rows = []
    for oy in (-1, 0, 1):
        for ox in (-1, 0, 1):
            ok = ((hh + oy >= 0) & (hh + oy < H) &
                  (ww + ox >= 0) & (ww + ox < W))
            rows.append(ok.reshape(-1))
    return jnp.asarray(np.stack(rows), dtype=jnp.float32)


def _wn_conv_params(key, cout, cin, kh, kw):
    """Deterministic weight-norm'd Conv2d(cin, cout, (kh, kw)) params (OIHW)."""
    kv, kg, kb = jax.random.split(key, 3)
    v = jax.random.normal(kv, (cout, cin, kh, kw), jnp.float32) * 0.1
    g = jax.random.uniform(kg, (cout,), jnp.float32, minval=0.5, maxval=1.5)
    b = jax.random.normal(kb, (cout,), jnp.float32) * 0.01
    norm = jnp.sqrt(jnp.sum(v * v, axis=(1, 2, 3), keepdims=True))
    w = g[:, None, None, None] * v / norm        # nn.utils.weight_norm, dim=0
    return w, b


def _embed_3x3(w):
    """Embed a 'same'-padded (Cout, Cin, kh, kw) kernel into (Cout, Cin, 3, 3)."""
    cout, cin, kh, kw = w.shape
    full = jnp.zeros((cout, cin, 3, 3), w.dtype)
    return full.at[:, :, (3 - kh) // 2:(3 - kh) // 2 + kh,
                   (3 - kw) // 2:(3 - kw) // 2 + kw].set(w)


def _pack_oihw_padded(w, cpad):
    """(Cout, Cin, 3, 3) -> (Cout, 9*cpad); columns ordered (ky, kx, ci) with
    zero columns for padded channels (matches the in-kernel im2col layout)."""
    cout, cin = w.shape[:2]
    wp = jnp.zeros((cout, cpad, 3, 3), w.dtype).at[:, :cin].set(w)
    return jnp.transpose(wp, (0, 2, 3, 1)).reshape(cout, 9 * cpad)


def init_rfem2_params(key, in_channels, out_channels):
    c_in, c_out = in_channels, out_channels
    keys = jax.random.split(key, 7)
    w33, b33 = _wn_conv_params(keys[0], c_out, c_in, 3, 3)            # con_3_3
    w13, b13 = _wn_conv_params(keys[1], c_out, c_in, 1, 3)            # conv_1_3
    w31, b31 = _wn_conv_params(keys[2], c_out, c_in, 3, 1)            # conv_3_1
    wcf, bcf = _wn_conv_params(keys[3], 2 * c_out, 3 * c_out, 1, 1)   # confusion
    wcf1, bcf1 = _wn_conv_params(keys[4], c_out, 3 * c_out, 1, 1)     # confusion1
    wc1, bc1 = _wn_conv_params(keys[5], c_out, 2 * c_out, 3, 3)       # conv1

    # Eval-mode BatchNorm2d(out_channels): fold running stats + affine.
    kg, kb2, km, kv2 = jax.random.split(keys[6], 4)
    gamma = jax.random.uniform(kg, (c_out,), jnp.float32, minval=0.75, maxval=1.25)
    beta = jax.random.normal(kb2, (c_out,), jnp.float32) * 0.1
    r_mean = jax.random.normal(km, (c_out,), jnp.float32) * 0.1
    r_var = jax.random.uniform(kv2, (c_out,), jnp.float32, minval=0.75, maxval=1.25)
    bn_scale = gamma / jnp.sqrt(r_var + 1e-5)
    bn_shift = beta - r_mean * bn_scale

    return dict(
        alpha=jnp.float32(0.25),                 # nn.PReLU() default init
        w33=w33, b33=b33, w13=w13, b13=b13, w31=w31, b31=b31,
        wcf=wcf, bcf=bcf, wcf1=wcf1, bcf1=bcf1, wc1=wc1, bc1=bc1,
        bn_scale=bn_scale, bn_shift=bn_shift,
    )


# ---------------------------------------------------------------------------
# forward wrapper
# ---------------------------------------------------------------------------

def rfem2_forward(x_nchw, params, *, images_per_step=None):
    N, c_in, H, W = x_nchw.shape
    HW = H * W
    c_out = params["w33"].shape[0]
    assert c_in == params["w33"].shape[1]
    assert c_in == c_out, "residual `out + x` requires in_channels == out_channels"

    cin_pad = _round_up(c_in, 8)        # f32 sublane-aligned im2col tap blocks
    cpad2 = _round_up(2 * c_out, 8)

    if images_per_step is None:
        # Amortize the ~600-cycle per-grid-step overhead: target >= ~2048 lanes
        # per step, capped so the (9*Cpad, L) bf16 im2col slabs stay well inside
        # VMEM (also on v7x's 64 MiB budget).
        want = max(1, -(-2048 // HW))
        cap = max(1, 16384 // HW)
        images_per_step = max(1, min(N, want, cap))
    while N % images_per_step:
        images_per_step -= 1
    nb = images_per_step
    num_steps = N // nb
    L = nb * HW

    shift_lanes = _lane_shift_fn()
    kernel = _make_rfem2_kernel(W, c_out, cpad2, shift_lanes)

    # Batch folded onto the lane axis: (N, Cin, H, W) -> (Cin_pad, N*HW).
    x_cl = jnp.transpose(x_nchw.reshape(N, c_in, HW), (1, 0, 2)).reshape(c_in, N * HW)
    if cin_pad > c_in:
        x_cl = jnp.concatenate(
            [x_cl, jnp.zeros((cin_pad - c_in, N * HW), x_cl.dtype)], axis=0)

    masks = jnp.tile(_border_masks(H, W), (1, nb))               # (9, L)

    col = lambda b: jnp.asarray(b, jnp.float32).reshape(-1, 1)
    # Stacked spatial weight [con_3_3; conv_3_1; conv_1_3] over one shared
    # 9-tap im2col (3x1 / 1x3 taps zero-padded); pre-cast to bf16.
    w_sp = jnp.concatenate(
        [_pack_oihw_padded(params["w33"], cin_pad),
         _pack_oihw_padded(_embed_3x3(params["w31"]), cin_pad),
         _pack_oihw_padded(_embed_3x3(params["w13"]), cin_pad)],
        axis=0).astype(jnp.bfloat16)                             # (3C, 9*cin_pad)
    b_sp = col(jnp.concatenate([params["b33"], params["b31"], params["b13"]]))
    # Stacked 1x1 weight [confusion (2C rows); confusion1 (C rows)].
    w11 = jnp.concatenate(
        [params["wcf"].reshape(2 * c_out, 3 * c_out),
         params["wcf1"].reshape(c_out, 3 * c_out)],
        axis=0).astype(jnp.bfloat16)                             # (3C, 3C)
    b11 = col(jnp.concatenate([params["bcf"], params["bcf1"]]))
    w_c1 = _pack_oihw_padded(params["wc1"], cpad2).astype(jnp.bfloat16)
    b_c1 = col(params["bc1"])
    bns = col(params["bn_scale"])
    bnb = col(params["bn_shift"])

    alpha = jnp.asarray(params["alpha"], jnp.float32).reshape(1)

    def resident(a):   # whole small array resident in VMEM, same block per step
        return pl.BlockSpec(a.shape, lambda n, _nd=a.ndim: (0,) * _nd)

    in_specs = [
        pl.BlockSpec(memory_space=pltpu.MemorySpace.SMEM),       # alpha
        pl.BlockSpec((cin_pad, L), lambda n: (0, n)),            # x lane block
        resident(masks),
        resident(w_sp), resident(b_sp),
        resident(w11), resident(b11),
        resident(w_c1), resident(b_c1),
        resident(bns), resident(bnb),
    ]
    out_specs = [
        pl.BlockSpec((c_out, L), lambda n: (0, n)),              # out
        pl.BlockSpec((3 * c_out, L), lambda n: (0, n)),          # out_DiVA
        pl.BlockSpec((c_out, L), lambda n: (0, n)),              # out_Multf
    ]
    out_shape = (
        jax.ShapeDtypeStruct((c_out, N * HW), x_nchw.dtype),
        jax.ShapeDtypeStruct((3 * c_out, N * HW), x_nchw.dtype),
        jax.ShapeDtypeStruct((c_out, N * HW), x_nchw.dtype),
    )

    flops = 2 * N * HW * (3 * c_out * 9 * cin_pad
                          + 3 * c_out * 3 * c_out
                          + c_out * 9 * cpad2)
    bytes_accessed = (4 * (x_cl.size + masks.size + N * HW * 5 * c_out)
                      + 2 * (w_sp.size + w11.size + w_c1.size)
                      + 4 * (b_sp.size + b11.size + b_c1.size
                             + bns.size + bnb.size))

    out, diva, multf = pl.pallas_call(
        kernel,
        out_shape=out_shape,
        grid=(num_steps,),
        in_specs=in_specs,
        out_specs=out_specs,
        compiler_params=pltpu.CompilerParams(
            dimension_semantics=("parallel",)),
        cost_estimate=pl.CostEstimate(
            flops=int(flops), transcendentals=0,
            bytes_accessed=int(bytes_accessed)),
    )(alpha, x_cl, masks, w_sp, b_sp, w11, b11, w_c1, b_c1, bns, bnb)

    def to_nchw(a, c):
        return jnp.transpose(a.reshape(c, N, H, W), (1, 0, 2, 3))

    return to_nchw(out, c_out), to_nchw(diva, 3 * c_out), to_nchw(multf, c_out)


class RFEM2Pallas:
    """JAX/Pallas equivalent of the PyTorch RFEM_2 module (inference forward)."""

    def __init__(self, in_channels, out_channels, key):
        assert in_channels == out_channels, "residual `out + x` needs Cin == Cout"
        self.params = init_rfem2_params(key, in_channels, out_channels)

    def __call__(self, x):
        return rfem2_forward(x, self.params)


# ---------------------------------------------------------------------------
# pure-JAX reference (same bf16 operand quantization as the kernel, f32 accum)
# ---------------------------------------------------------------------------

def _ref_forward(x, params):
    a = params["alpha"]
    prelu = lambda v: jnp.where(v >= 0, v, a * v)

    def conv(v, w, b, pad):
        y = jax.lax.conv_general_dilated(
            v.astype(jnp.bfloat16), w.astype(jnp.bfloat16),
            window_strides=(1, 1), padding=pad,
            dimension_numbers=("NCHW", "OIHW", "NCHW"),
            preferred_element_type=jnp.float32)
        return y + b[None, :, None, None]

    xin = prelu(x)
    out_x = conv(xin, params["w33"], params["b33"], [(1, 1), (1, 1)])
    out_v = conv(xin, params["w13"], params["b13"], [(0, 0), (1, 1)])
    out_h = conv(xin, params["w31"], params["b31"], [(1, 1), (0, 0)])
    oam = jnp.concatenate([out_x, out_h, out_v], axis=1)
    out_diva = oam                                   # DiVA_attention: identity
    oam_p = prelu(oam)
    out_multf = conv(oam_p, params["wcf1"], params["bcf1"], [(0, 0), (0, 0)])
    cat = conv(oam_p, params["wcf"], params["bcf"], [(0, 0), (0, 0)])
    c1 = conv(prelu(cat), params["wc1"], params["bc1"], [(1, 1), (1, 1)])
    out = (params["bn_scale"][None, :, None, None] * c1
           + params["bn_shift"][None, :, None, None] + x)
    return out, out_diva, out_multf


# ---------------------------------------------------------------------------
# main
# ---------------------------------------------------------------------------

if __name__ == "__main__":
    key = jax.random.PRNGKey(0)
    kx, kp = jax.random.split(key)

    N, C, H, W = 2, 4, 16, 16
    x = jax.random.normal(kx, (N, C, H, W), jnp.float32)

    model = RFEM2Pallas(in_channels=C, out_channels=C, key=kp)

    out, out_diva, out_multf = jax.block_until_ready(model(x))

    assert out.shape == (N, C, H, W), out.shape
    assert out_diva.shape == (N, 3 * C, H, W), out_diva.shape
    assert out_multf.shape == (N, C, H, W), out_multf.shape

    ref = _ref_forward(x, model.params)
    for got, want, name in zip((out, out_diva, out_multf), ref,
                               ("out", "out_DiVA", "out_Multf")):
        err = float(jnp.max(jnp.abs(got - want)))
        assert jnp.allclose(got, want, rtol=2e-2, atol=2e-2), (name, err)

    print("KERNEL_OK")
</pallas_src>

<mosaic_0001>
module attributes {stable_mosaic.version = 11 : i64} {
  func.func @_probe(%arg0: memref<8x128xf32, #tpu.memory_space<vmem>>, %arg1: memref<8x128xf32, #tpu.memory_space<vmem>>) attributes {dimension_semantics = [], scalar_prefetch = 0 : i64, scratch_operands = 0 : i64, tpu.core_type = #tpu.core_type<tc>} {
    %c0 = arith.constant 0 : index
    %c0_0 = arith.constant 0 : index
    %0 = vector.load %arg0[%c0, %c0_0] : memref<8x128xf32, #tpu.memory_space<vmem>>, vector<8x128xf32>
    %c1_i32 = arith.constant 1 : i32
    %1 = tpu.dynamic_rotate %0 by %c1_i32 dim 1 : vector<8x128xf32>, i32 -> vector<8x128xf32>
    %c0_1 = arith.constant 0 : index
    %c0_2 = arith.constant 0 : index
    %2 = vector.load %arg1[%c0_1, %c0_2] : memref<8x128xf32, #tpu.memory_space<vmem>>, vector<8x128xf32>
    tpu.vector_store %arg1[%c0_1, %c0_2], %1 {strides = array<i32>} : memref<8x128xf32, #tpu.memory_space<vmem>>, vector<8x128xf32>,
    return
  }
}

module attributes {stable_mosaic.version = 11 : i64} {
  func.func @kernel(%arg0: i32, %arg1: memref<1xf32, #tpu.memory_space<smem>>, %arg2: memref<8x512xf32, #tpu.memory_space<vmem>>, %arg3: memref<9x512xf32, #tpu.memory_space<vmem>>, %arg4: memref<12x72xbf16, #tpu.memory_space<vmem>>, %arg5: memref<12x1xf32, #tpu.memory_space<vmem>>, %arg6: memref<12x12xbf16, #tpu.memory_space<vmem>>, %arg7: memref<12x1xf32, #tpu.memory_space<vmem>>, %arg8: memref<4x72xbf16, #tpu.memory_space<vmem>>, %arg9: memref<4x1xf32, #tpu.memory_space<vmem>>, %arg10: memref<4x1xf32, #tpu.memory_space<vmem>>, %arg11: memref<4x1xf32, #tpu.memory_space<vmem>>, %arg12: memref<4x512xf32, #tpu.memory_space<vmem>>, %arg13: memref<12x512xf32, #tpu.memory_space<vmem>>, %arg14: memref<4x512xf32, #tpu.memory_space<vmem>>) attributes {dimension_semantics = [#tpu.dimension_semantics<parallel>], iteration_bounds = array<i64: 1>, scalar_prefetch = 0 : i64, scratch_operands = 0 : i64, tpu.core_type = #tpu.core_type<tc>, window_params = [{transform_indices = @transform_0, window_bounds = array<i64: 1>}, {transform_indices = @transform_1, window_bounds = array<i64: 8, 512>}, {pipeline_mode = #tpu.pipeline_mode<synchronous>, transform_indices = @transform_2, window_bounds = array<i64: 9, 512>}, {pipeline_mode = #tpu.pipeline_mode<synchronous>, transform_indices = @transform_3, window_bounds = array<i64: 12, 72>}, {pipeline_mode = #tpu.pipeline_mode<synchronous>, transform_indices = @transform_4, window_bounds = array<i64: 12, 1>}, {pipeline_mode = #tpu.pipeline_mode<synchronous>, transform_indices = @transform_5, window_bounds = array<i64: 12, 12>}, {pipeline_mode = #tpu.pipeline_mode<synchronous>, transform_indices = @transform_6, window_bounds = array<i64: 12, 1>}, {pipeline_mode = #tpu.pipeline_mode<synchronous>, transform_indices = @transform_7, window_bounds = array<i64: 4, 72>}, {pipeline_mode = #tpu.pipeline_mode<synchronous>, transform_indices = @transform_8, window_bounds = array<i64: 4, 1>}, {pipeline_mode = #tpu.pipeline_mode<synchronous>, transform_indices = @transform_9, window_bounds = array<i64: 4, 1>}, {pipeline_mode = #tpu.pipeline_mode<synchronous>, transform_indices = @transform_10, window_bounds = array<i64: 4, 1>}, {transform_indices = @transform_11, window_bounds = array<i64: 4, 512>}, {transform_indices = @transform_12, window_bounds = array<i64: 12, 512>}, {transform_indices = @transform_13, window_bounds = array<i64: 4, 512>}]} {
    %c0 = arith.constant 0 : index
    %0 = memref.load %arg1[%c0] : memref<1xf32, #tpu.memory_space<smem>>
    %c0_0 = arith.constant 0 : index
    %c0_1 = arith.constant 0 : index
    %1 = vector.load %arg2[%c0_0, %c0_1] : memref<8x512xf32, #tpu.memory_space<vmem>>, vector<8x512xf32>
    %c0_2 = arith.constant 0 : index
    %c0_3 = arith.constant 0 : index
    %2 = vector.load %arg3[%c0_2, %c0_3] : memref<9x512xf32, #tpu.memory_space<vmem>>, vector<9x512xf32>
    %cst = arith.constant 0.000000e+00 : f32
    %3 = vector.broadcast %cst : f32 to vector<8x512xf32>
    %4 = arith.cmpf oge, %1, %3 : vector<8x512xf32>
    %5 = vector.broadcast %0 : f32 to vector<8x512xf32>
    %6 = arith.mulf %5, %1 : vector<8x512xf32>
    %7 = arith.select %4, %1, %6 : vector<8x512xi1>, vector<8x512xf32>
    %8 = vector.extract_strided_slice %2 {offsets = [0, 0], sizes = [1, 512], strides = [1, 1]} : vector<9x512xf32> to vector<1x512xf32>
    %9 = vector.shape_cast %8 : vector<1x512xf32> to vector<512xf32>
    %10 = vector.shape_cast %9 : vector<512xf32> to vector<1x512xf32>
    %11 = vector.extract_strided_slice %7 {offsets = [0, 495], sizes = [8, 17], strides = [1, 1]} : vector<8x512xf32> to vector<8x17xf32>
    %12 = vector.extract_strided_slice %7 {offsets = [0, 0], sizes = [8, 495], strides = [1, 1]} : vector<8x512xf32> to vector<8x495xf32>
    %13 = tpu.concatenate %11, %12 in 1 : vector<8x17xf32>, vector<8x495xf32> -> vector<8x512xf32>
    %14 = vector.broadcast %10 : vector<1x512xf32> to vector<8x512xf32>
    %15 = arith.mulf %13, %14 : vector<8x512xf32>
    %16 = vector.extract_strided_slice %2 {offsets = [1, 0], sizes = [1, 512], strides = [1, 1]} : vector<9x512xf32> to vector<1x512xf32>
    %17 = vector.shape_cast %16 : vector<1x512xf32> to vector<512xf32>
    %18 = vector.shape_cast %17 : vector<512xf32> to vector<1x512xf32>
    %19 = vector.extract_strided_slice %7 {offsets = [0, 496], sizes = [8, 16], strides = [1, 1]} : vector<8x512xf32> to vector<8x16xf32>
    %20 = vector.extract_strided_slice %7 {offsets = [0, 0], sizes = [8, 496], strides = [1, 1]} : vector<8x512xf32> to vector<8x496xf32>
    %21 = tpu.concatenate %19, %20 in 1 : vector<8x16xf32>, vector<8x496xf32> -> vector<8x512xf32>
    %22 = vector.broadcast %18 : vector<1x512xf32> to vector<8x512xf32>
    %23 = arith.mulf %21, %22 : vector<8x512xf32>
    %24 = vector.extract_strided_slice %2 {offsets = [2, 0], sizes = [1, 512], strides = [1, 1]} : vector<9x512xf32> to vector<1x512xf32>
    %25 = vector.shape_cast %24 : vector<1x512xf32> to vector<512xf32>
    %26 = vector.shape_cast %25 : vector<512xf32> to vector<1x512xf32>
    %27 = vector.extract_strided_slice %7 {offsets = [0, 497], sizes = [8, 15], strides = [1, 1]} : vector<8x512xf32> to vector<8x15xf32>
    %28 = vector.extract_strided_slice %7 {offsets = [0, 0], sizes = [8, 497], strides = [1, 1]} : vector<8x512xf32> to vector<8x497xf32>
    %29 = tpu.concatenate %27, %28 in 1 : vector<8x15xf32>, vector<8x497xf32> -> vector<8x512xf32>
    %30 = vector.broadcast %26 : vector<1x512xf32> to vector<8x512xf32>
    %31 = arith.mulf %29, %30 : vector<8x512xf32>
    %32 = vector.extract_strided_slice %2 {offsets = [3, 0], sizes = [1, 512], strides = [1, 1]} : vector<9x512xf32> to vector<1x512xf32>
    %33 = vector.shape_cast %32 : vector<1x512xf32> to vector<512xf32>
    %34 = vector.shape_cast %33 : vector<512xf32> to vector<1x512xf32>
    %35 = vector.extract_strided_slice %7 {offsets = [0, 511], sizes = [8, 1], strides = [1, 1]} : vector<8x512xf32> to vector<8x1xf32>
    %36 = vector.extract_strided_slice %7 {offsets = [0, 0], sizes = [8, 511], strides = [1, 1]} : vector<8x512xf32> to vector<8x511xf32>
    %37 = tpu.concatenate %35, %36 in 1 : vector<8x1xf32>, vector<8x511xf32> -> vector<8x512xf32>
    %38 = vector.broadcast %34 : vector<1x512xf32> to vector<8x512xf32>
    %39 = arith.mulf %37, %38 : vector<8x512xf32>
    %40 = vector.extract_strided_slice %2 {offsets = [5, 0], sizes = [1, 512], strides = [1, 1]} : vector<9x512xf32> to vector<1x512xf32>
    %41 = vector.shape_cast %40 : vector<1x512xf32> to vector<512xf32>
    %42 = vector.shape_cast %41 : vector<512xf32> to vector<1x512xf32>
    %43 = vector.extract_strided_slice %7 {offsets = [0, 1], sizes = [8, 511], strides = [1, 1]} : vector<8x512xf32> to vector<8x511xf32>
    %44 = vector.extract_strided_slice %7 {offsets = [0, 0], sizes = [8, 1], strides = [1, 1]} : vector<8x512xf32> to vector<8x1xf32>
    %45 = tpu.concatenate %43, %44 in 1 : vector<8x511xf32>, vector<8x1xf32> -> vector<8x512xf32>
    %46 = vector.broadcast %42 : vector<1x512xf32> to vector<8x512xf32>
    %47 = arith.mulf %45, %46 : vector<8x512xf32>
    %48 = vector.extract_strided_slice %2 {offsets = [6, 0], sizes = [1, 512], strides = [1, 1]} : vector<9x512xf32> to vector<1x512xf32>
    %49 = vector.shape_cast %48 : vector<1x512xf32> to vector<512xf32>
    %50 = vector.shape_cast %49 : vector<512xf32> to vector<1x512xf32>
    %51 = vector.extract_strided_slice %7 {offsets = [0, 15], sizes = [8, 497], strides = [1, 1]} : vector<8x512xf32> to vector<8x497xf32>
    %52 = vector.extract_strided_slice %7 {offsets = [0, 0], sizes = [8, 15], strides = [1, 1]} : vector<8x512xf32> to vector<8x15xf32>
    %53 = tpu.concatenate %51, %52 in 1 : vector<8x497xf32>, vector<8x15xf32> -> vector<8x512xf32>
    %54 = vector.broadcast %50 : vector<1x512xf32> to vector<8x512xf32>
    %55 = arith.mulf %53, %54 : vector<8x512xf32>
    %56 = vector.extract_strided_slice %2 {offsets = [7, 0], sizes = [1, 512], strides = [1, 1]} : vector<9x512xf32> to vector<1x512xf32>
    %57 = vector.shape_cast %56 : vector<1x512xf32> to vector<512xf32>
    %58 = vector.shape_cast %57 : vector<512xf32> to vector<1x512xf32>
    %59 = vector.extract_strided_slice %7 {offsets = [0, 16], sizes = [8, 496], strides = [1, 1]} : vector<8x512xf32> to vector<8x496xf32>
    %60 = vector.extract_strided_slice %7 {offsets = [0, 0], sizes = [8, 16], strides = [1, 1]} : vector<8x512xf32> to vector<8x16xf32>
    %61 = tpu.concatenate %59, %60 in 1 : vector<8x496xf32>, vector<8x16xf32> -> vector<8x512xf32>
    %62 = vector.broadcast %58 : vector<1x512xf32> to vector<8x512xf32>
    %63 = arith.mulf %61, %62 : vector<8x512xf32>
    %64 = vector.extract_strided_slice %2 {offsets = [8, 0], sizes = [1, 512], strides = [1, 1]} : vector<9x512xf32> to vector<1x512xf32>
    %65 = vector.shape_cast %64 : vector<1x512xf32> to vector<512xf32>
    %66 = vector.shape_cast %65 : vector<512xf32> to vector<1x512xf32>
    %67 = vector.extract_strided_slice %7 {offsets = [0, 17], sizes = [8, 495], strides = [1, 1]} : vector<8x512xf32> to vector<8x495xf32>
    %68 = vector.extract_strided_slice %7 {offsets = [0, 0], sizes = [8, 17], strides = [1, 1]} : vector<8x512xf32> to vector<8x17xf32>
    %69 = tpu.concatenate %67, %68 in 1 : vector<8x495xf32>, vector<8x17xf32> -> vector<8x512xf32>
    %70 = vector.broadcast %66 : vector<1x512xf32> to vector<8x512xf32>
    %71 = arith.mulf %69, %70 : vector<8x512xf32>
    %72 = tpu.concatenate %15, %23, %31, %39, %7, %47, %55, %63, %71 in 0 : vector<8x512xf32>, vector<8x512xf32>, vector<8x512xf32>, vector<8x512xf32>, vector<8x512xf32>, vector<8x512xf32>, vector<8x512xf32>, vector<8x512xf32>, vector<8x512xf32> -> vector<72x512xf32>
    %73 = arith.truncf %72 : vector<72x512xf32> to vector<72x512xbf16>
    %c0_4 = arith.constant 0 : index
    %c0_5 = arith.constant 0 : index
    %74 = vector.load %arg4[%c0_4, %c0_5] : memref<12x72xbf16, #tpu.memory_space<vmem>>, vector<12x72xbf16>
    %cst_6 = arith.constant dense<0.000000e+00> : vector<12x512xf32>
    %75 = tpu.matmul %74, %73, %cst_6 {dimension_numbers = #tpu.dot_dimension_numbers<[1], [0], [0], [1], [0, 0, 1, 1], [], []>} : vector<12x72xbf16>, vector<72x512xbf16>, vector<12x512xf32> -> vector<12x512xf32>
    %c0_7 = arith.constant 0 : index
    %c0_8 = arith.constant 0 : index
    %76 = vector.load %arg5[%c0_7, %c0_8] : memref<12x1xf32, #tpu.memory_space<vmem>>, vector<12x1xf32>
    %77 = vector.broadcast %76 : vector<12x1xf32> to vector<12x512xf32>
    %78 = arith.addf %75, %77 : vector<12x512xf32>
    %c0_9 = arith.constant 0 : index
    %c0_10 = arith.constant 0 : index
    %79 = vector.load %arg13[%c0_9, %c0_10] : memref<12x512xf32, #tpu.memory_space<vmem>>, vector<12x512xf32>
    tpu.vector_store %arg13[%c0_9, %c0_10], %78 {strides = array<i32>} : memref<12x512xf32, #tpu.memory_space<vmem>>, vector<12x512xf32>,
    %cst_11 = arith.constant 0.000000e+00 : f32
    %80 = vector.broadcast %cst_11 : f32 to vector<12x512xf32>
    %81 = arith.cmpf oge, %78, %80 : vector<12x512xf32>
    %82 = vector.broadcast %0 : f32 to vector<12x512xf32>
    %83 = arith.mulf %82, %78 : vector<12x512xf32>
    %84 = arith.select %81, %78, %83 : vector<12x512xi1>, vector<12x512xf32>
    %85 = arith.truncf %84 : vector<12x512xf32> to vector<12x512xbf16>
    %c0_12 = arith.constant 0 : index
    %c0_13 = arith.constant 0 : index
    %86 = vector.load %arg6[%c0_12, %c0_13] : memref<12x12xbf16, #tpu.memory_space<vmem>>, vector<12x12xbf16>
    %cst_14 = arith.constant dense<0.000000e+00> : vector<12x512xf32>
    %87 = tpu.matmul %86, %85, %cst_14 {dimension_numbers = #tpu.dot_dimension_numbers<[1], [0], [0], [1], [0, 0, 1, 1], [], []>} : vector<12x12xbf16>, vector<12x512xbf16>, vector<12x512xf32> -> vector<12x512xf32>
    %c0_15 = arith.constant 0 : index
    %c0_16 = arith.constant 0 : index
    %88 = vector.load %arg7[%c0_15, %c0_16] : memref<12x1xf32, #tpu.memory_space<vmem>>, vector<12x1xf32>
    %89 = vector.broadcast %88 : vector<12x1xf32> to vector<12x512xf32>
    %90 = arith.addf %87, %89 : vector<12x512xf32>
    %91 = vector.extract_strided_slice %90 {offsets = [8, 0], sizes = [4, 512], strides = [1, 1]} : vector<12x512xf32> to vector<4x512xf32>
    %c0_17 = arith.constant 0 : index
    %c0_18 = arith.constant 0 : index
    %92 = vector.load %arg14[%c0_17, %c0_18] : memref<4x512xf32, #tpu.memory_space<vmem>>, vector<4x512xf32>
    tpu.vector_store %arg14[%c0_17, %c0_18], %91 {strides = array<i32>} : memref<4x512xf32, #tpu.memory_space<vmem>>, vector<4x512xf32>,
    %93 = vector.extract_strided_slice %90 {offsets = [0, 0], sizes = [8, 512], strides = [1, 1]} : vector<12x512xf32> to vector<8x512xf32>
    %cst_19 = arith.constant 0.000000e+00 : f32
    %94 = vector.broadcast %cst_19 : f32 to vector<8x512xf32>
    %95 = arith.cmpf oge, %93, %94 : vector<8x512xf32>
    %96 = vector.broadcast %0 : f32 to vector<8x512xf32>
    %97 = arith.mulf %96, %93 : vector<8x512xf32>
    %98 = arith.select %95, %93, %97 : vector<8x512xi1>, vector<8x512xf32>
    %99 = vector.extract_strided_slice %2 {offsets = [0, 0], sizes = [1, 512], strides = [1, 1]} : vector<9x512xf32> to vector<1x512xf32>
    %100 = vector.shape_cast %99 : vector<1x512xf32> to vector<512xf32>
    %101 = vector.shape_cast %100 : vector<512xf32> to vector<1x512xf32>
    %102 = vector.extract_strided_slice %98 {offsets = [0, 495], sizes = [8, 17], strides = [1, 1]} : vector<8x512xf32> to vector<8x17xf32>
    %103 = vector.extract_strided_slice %98 {offsets = [0, 0], sizes = [8, 495], strides = [1, 1]} : vector<8x512xf32> to vector<8x495xf32>
    %104 = tpu.concatenate %102, %103 in 1 : vector<8x17xf32>, vector<8x495xf32> -> vector<8x512xf32>
    %105 = vector.broadcast %101 : vector<1x512xf32> to vector<8x512xf32>
    %106 = arith.mulf %104, %105 : vector<8x512xf32>
    %107 = vector.extract_strided_slice %2 {offsets = [1, 0], sizes = [1, 512], strides = [1, 1]} : vector<9x512xf32> to vector<1x512xf32>
    %108 = vector.shape_cast %107 : vector<1x512xf32> to vector<512xf32>
    %109 = vector.shape_cast %108 : vector<512xf32> to vector<1x512xf32>
    %110 = vector.extract_strided_slice %98 {offsets = [0, 496], sizes = [8, 16], strides = [1, 1]} : vector<8x512xf32> to vector<8x16xf32>
    %111 = vector.extract_strided_slice %98 {offsets = [0, 0], sizes = [8, 496], strides = [1, 1]} : vector<8x512xf32> to vector<8x496xf32>
    %112 = tpu.concatenate %110, %111 in 1 : vector<8x16xf32>, vector<8x496xf32> -> vector<8x512xf32>
    %113 = vector.broadcast %109 : vector<1x512xf32> to vector<8x512xf32>
    %114 = arith.mulf %112, %113 : vector<8x512xf32>
    %115 = vector.extract_strided_slice %2 {offsets = [2, 0], sizes = [1, 512], strides = [1, 1]} : vector<9x512xf32> to vector<1x512xf32>
    %116 = vector.shape_cast %115 : vector<1x512xf32> to vector<512xf32>
    %117 = vector.shape_cast %116 : vector<512xf32> to vector<1x512xf32>
    %118 = vector.extract_strided_slice %98 {offsets = [0, 497], sizes = [8, 15], strides = [1, 1]} : vector<8x512xf32> to vector<8x15xf32>
    %119 = vector.extract_strided_slice %98 {offsets = [0, 0], sizes = [8, 497], strides = [1, 1]} : vector<8x512xf32> to vector<8x497xf32>
    %120 = tpu.concatenate %118, %119 in 1 : vector<8x15xf32>, vector<8x497xf32> -> vector<8x512xf32>
    %121 = vector.broadcast %117 : vector<1x512xf32> to vector<8x512xf32>
    %122 = arith.mulf %120, %121 : vector<8x512xf32>
    %123 = vector.extract_strided_slice %2 {offsets = [3, 0], sizes = [1, 512], strides = [1, 1]} : vector<9x512xf32> to vector<1x512xf32>
    %124 = vector.shape_cast %123 : vector<1x512xf32> to vector<512xf32>
    %125 = vector.shape_cast %124 : vector<512xf32> to vector<1x512xf32>
    %126 = vector.extract_strided_slice %98 {offsets = [0, 511], sizes = [8, 1], strides = [1, 1]} : vector<8x512xf32> to vector<8x1xf32>
    %127 = vector.extract_strided_slice %98 {offsets = [0, 0], sizes = [8, 511], strides = [1, 1]} : vector<8x512xf32> to vector<8x511xf32>
    %128 = tpu.concatenate %126, %127 in 1 : vector<8x1xf32>, vector<8x511xf32> -> vector<8x512xf32>
    %129 = vector.broadcast %125 : vector<1x512xf32> to vector<8x512xf32>
    %130 = arith.mulf %128, %129 : vector<8x512xf32>
    %131 = vector.extract_strided_slice %2 {offsets = [5, 0], sizes = [1, 512], strides = [1, 1]} : vector<9x512xf32> to vector<1x512xf32>
    %132 = vector.shape_cast %131 : vector<1x512xf32> to vector<512xf32>
    %133 = vector.shape_cast %132 : vector<512xf32> to vector<1x512xf32>
    %134 = vector.extract_strided_slice %98 {offsets = [0, 1], sizes = [8, 511], strides = [1, 1]} : vector<8x512xf32> to vector<8x511xf32>
    %135 = vector.extract_strided_slice %98 {offsets = [0, 0], sizes = [8, 1], strides = [1, 1]} : vector<8x512xf32> to vector<8x1xf32>
    %136 = tpu.concatenate %134, %135 in 1 : vector<8x511xf32>, vector<8x1xf32> -> vector<8x512xf32>
    %137 = vector.broadcast %133 : vector<1x512xf32> to vector<8x512xf32>
    %138 = arith.mulf %136, %137 : vector<8x512xf32>
    %139 = vector.extract_strided_slice %2 {offsets = [6, 0], sizes = [1, 512], strides = [1, 1]} : vector<9x512xf32> to vector<1x512xf32>
    %140 = vector.shape_cast %139 : vector<1x512xf32> to vector<512xf32>
    %141 = vector.shape_cast %140 : vector<512xf32> to vector<1x512xf32>
    %142 = vector.extract_strided_slice %98 {offsets = [0, 15], sizes = [8, 497], strides = [1, 1]} : vector<8x512xf32> to vector<8x497xf32>
    %143 = vector.extract_strided_slice %98 {offsets = [0, 0], sizes = [8, 15], strides = [1, 1]} : vector<8x512xf32> to vector<8x15xf32>
    %144 = tpu.concatenate %142, %143 in 1 : vector<8x497xf32>, vector<8x15xf32> -> vector<8x512xf32>
    %145 = vector.broadcast %141 : vector<1x512xf32> to vector<8x512xf32>
    %146 = arith.mulf %144, %145 : vector<8x512xf32>
    %147 = vector.extract_strided_slice %2 {offsets = [7, 0], sizes = [1, 512], strides = [1, 1]} : vector<9x512xf32> to vector<1x512xf32>
    %148 = vector.shape_cast %147 : vector<1x512xf32> to vector<512xf32>
    %149 = vector.shape_cast %148 : vector<512xf32> to vector<1x512xf32>
    %150 = vector.extract_strided_slice %98 {offsets = [0, 16], sizes = [8, 496], strides = [1, 1]} : vector<8x512xf32> to vector<8x496xf32>
    %151 = vector.extract_strided_slice %98 {offsets = [0, 0], sizes = [8, 16], strides = [1, 1]} : vector<8x512xf32> to vector<8x16xf32>
    %152 = tpu.concatenate %150, %151 in 1 : vector<8x496xf32>, vector<8x16xf32> -> vector<8x512xf32>
    %153 = vector.broadcast %149 : vector<1x512xf32> to vector<8x512xf32>
    %154 = arith.mulf %152, %153 : vector<8x512xf32>
    %155 = vector.extract_strided_slice %2 {offsets = [8, 0], sizes = [1, 512], strides = [1, 1]} : vector<9x512xf32> to vector<1x512xf32>
    %156 = vector.shape_cast %155 : vector<1x512xf32> to vector<512xf32>
    %157 = vector.shape_cast %156 : vector<512xf32> to vector<1x512xf32>
    %158 = vector.extract_strided_slice %98 {offsets = [0, 17], sizes = [8, 495], strides = [1, 1]} : vector<8x512xf32> to vector<8x495xf32>
    %159 = vector.extract_strided_slice %98 {offsets = [0, 0], sizes = [8, 17], strides = [1, 1]} : vector<8x512xf32> to vector<8x17xf32>
    %160 = tpu.concatenate %158, %159 in 1 : vector<8x495xf32>, vector<8x17xf32> -> vector<8x512xf32>
    %161 = vector.broadcast %157 : vector<1x512xf32> to vector<8x512xf32>
    %162 = arith.mulf %160, %161 : vector<8x512xf32>
    %163 = tpu.concatenate %106, %114, %122, %130, %98, %138, %146, %154, %162 in 0 : vector<8x512xf32>, vector<8x512xf32>, vector<8x512xf32>, vector<8x512xf32>, vector<8x512xf32>, vector<8x512xf32>, vector<8x512xf32>, vector<8x512xf32>, vector<8x512xf32> -> vector<72x512xf32>
    %164 = arith.truncf %163 : vector<72x512xf32> to vector<72x512xbf16>
    %c0_20 = arith.constant 0 : index
    %c0_21 = arith.constant 0 : index
    %165 = vector.load %arg8[%c0_20, %c0_21] : memref<4x72xbf16, #tpu.memory_space<vmem>>, vector<4x72xbf16>
    %cst_22 = arith.constant dense<0.000000e+00> : vector<4x512xf32>
    %166 = tpu.matmul %165, %164, %cst_22 {dimension_numbers = #tpu.dot_dimension_numbers<[1], [0], [0], [1], [0, 0, 1, 1], [], []>} : vector<4x72xbf16>, vector<72x512xbf16>, vector<4x512xf32> -> vector<4x512xf32>
    %c0_23 = arith.constant 0 : index
    %c0_24 = arith.constant 0 : index
    %167 = vector.load %arg9[%c0_23, %c0_24] : memref<4x1xf32, #tpu.memory_space<vmem>>, vector<4x1xf32>
    %168 = vector.broadcast %167 : vector<4x1xf32> to vector<4x512xf32>
    %169 = arith.addf %166, %168 : vector<4x512xf32>
    %c0_25 = arith.constant 0 : index
    %c0_26 = arith.constant 0 : index
    %170 = vector.load %arg10[%c0_25, %c0_26] : memref<4x1xf32, #tpu.memory_space<vmem>>, vector<4x1xf32>
    %171 = vector.broadcast %170 : vector<4x1xf32> to vector<4x512xf32>
    %172 = arith.mulf %171, %169 : vector<4x512xf32>
    %c0_27 = arith.constant 0 : index
    %c0_28 = arith.constant 0 : index
    %173 = vector.load %arg11[%c0_27, %c0_28] : memref<4x1xf32, #tpu.memory_space<vmem>>, vector<4x1xf32>
    %174 = vector.broadcast %173 : vector<4x1xf32> to vector<4x512xf32>
    %175 = arith.addf %172, %174 : vector<4x512xf32>
    %176 = vector.extract_strided_slice %1 {offsets = [0, 0], sizes = [4, 512], strides = [1, 1]} : vector<8x512xf32> to vector<4x512xf32>
    %177 = arith.addf %175, %176 : vector<4x512xf32>
    %c0_29 = arith.constant 0 : index
    %c0_30 = arith.constant 0 : index
    %178 = vector.load %arg12[%c0_29, %c0_30] : memref<4x512xf32, #tpu.memory_space<vmem>>, vector<4x512xf32>
    tpu.vector_store %arg12[%c0_29, %c0_30], %177 {strides = array<i32>} : memref<4x512xf32, #tpu.memory_space<vmem>>, vector<4x512xf32>,
    return
  }
  func.func @transform_0(%arg0: i32) -> i32 {
    %c0_i32 = arith.constant 0 : i32
    %c0_i32_0 = arith.constant 0 : i32
    return %c0_i32 : i32
  }
  func.func @transform_1(%arg0: i32) -> (i32, i32) {
    %c0_i32 = arith.constant 0 : i32
    %c0_i32_0 = arith.constant 0 : i32
    return %c0_i32, %arg0 : i32, i32
  }
  func.func @transform_2(%arg0: i32) -> (i32, i32) {
    %c0_i32 = arith.constant 0 : i32
    %c0_i32_0 = arith.constant 0 : i32
    %c0_i32_1 = arith.constant 0 : i32
    return %c0_i32, %c0_i32_0 : i32, i32
  }
  func.func @transform_3(%arg0: i32) -> (i32, i32) {
    %c0_i32 = arith.constant 0 : i32
    %c0_i32_0 = arith.constant 0 : i32
    %c0_i32_1 = arith.constant 0 : i32
    return %c0_i32, %c0_i32_0 : i32, i32
  }
  func.func @transform_4(%arg0: i32) -> (i32, i32) {
    %c0_i32 = arith.constant 0 : i32
    %c0_i32_0 = arith.constant 0 : i32
    %c0_i32_1 = arith.constant 0 : i32
    return %c0_i32, %c0_i32_0 : i32, i32
  }
  func.func @transform_5(%arg0: i32) -> (i32, i32) {
    %c0_i32 = arith.constant 0 : i32
    %c0_i32_0 = arith.constant 0 : i32
    %c0_i32_1 = arith.constant 0 : i32
    return %c0_i32, %c0_i32_0 : i32, i32
  }
  func.func @transform_6(%arg0: i32) -> (i32, i32) {
    %c0_i32 = arith.constant 0 : i32
    %c0_i32_0 = arith.constant 0 : i32
    %c0_i32_1 = arith.constant 0 : i32
    return %c0_i32, %c0_i32_0 : i32, i32
  }
  func.func @transform_7(%arg0: i32) -> (i32, i32) {
    %c0_i32 = arith.constant 0 : i32
    %c0_i32_0 = arith.constant 0 : i32
    %c0_i32_1 = arith.constant 0 : i32
    return %c0_i32, %c0_i32_0 : i32, i32
  }
  func.func @transform_8(%arg0: i32) -> (i32, i32) {
    %c0_i32 = arith.constant 0 : i32
    %c0_i32_0 = arith.constant 0 : i32
    %c0_i32_1 = arith.constant 0 : i32
    return %c0_i32, %c0_i32_0 : i32, i32
  }
  func.func @transform_9(%arg0: i32) -> (i32, i32) {
    %c0_i32 = arith.constant 0 : i32
    %c0_i32_0 = arith.constant 0 : i32
    %c0_i32_1 = arith.constant 0 : i32
    return %c0_i32, %c0_i32_0 : i32, i32
  }
  func.func @transform_10(%arg0: i32) -> (i32, i32) {
    %c0_i32 = arith.constant 0 : i32
    %c0_i32_0 = arith.constant 0 : i32
    %c0_i32_1 = arith.constant 0 : i32
    return %c0_i32, %c0_i32_0 : i32, i32
  }
  func.func @transform_11(%arg0: i32) -> (i32, i32) {
    %c0_i32 = arith.constant 0 : i32
    %c0_i32_0 = arith.constant 0 : i32
    return %c0_i32, %arg0 : i32, i32
  }
  func.func @transform_12(%arg0: i32) -> (i32, i32) {
    %c0_i32 = arith.constant 0 : i32
    %c0_i32_0 = arith.constant 0 : i32
    return %c0_i32, %arg0 : i32, i32
  }
  func.func @transform_13(%arg0: i32) -> (i32, i32) {
    %c0_i32 = arith.constant 0 : i32
    %c0_i32_0 = arith.constant 0 : i32
    return %c0_i32, %arg0 : i32, i32
  }
}

</mosaic_0001>

<bundles_post_ra>
// kernel: tpu_custom_call.1
= control target key start
LH: loop header
LB: loop body
LE: loop exit
PB: predicated region body
PF: predicated region fallthrough
CT: control target
= control target key end

     0   :  { %6 = vsyncpa [#allocation3], 0  ;;  %s106_s0 = inlined_call_operand.hbm [shape: f32[8,128], index: 0, kind: input, shape index: {}]   ;;  %s107_s1 = inlined_call_operand.hbm [shape: f32[8,128], index: 1, kind: output, shape index: {}]  }
   0x1   :  { %7 = vsyncpa [#allocation4], 0  ;;  %s87_s6 = smov [#allocation2]  }
   0x2   :  { %s14_s7 = sshll.u32 %s87_s6, 4  ;;  %s15_s7 = int_to_ptr.vmem [resolvable:$true] %s14_s7 }
   0x3   :  { %s51_s8 = scalar_lea.vmem %s15_s7, 128  ;;  %p56_p1 = scmp.lt.s32.totalorder %s15_s7, %s15_s7 }
   0x4   :  { %p52_p0 = scmp.ne.s32.totalorder %s15_s7, %s51_s8  ;;  %p57_p2 = scmp.lt.s32.totalorder %s51_s8, %s51_s8 }
   0x6   :  { %p58_p3 = por %p57_p2, %p56_p1 }
   0x8   :  { %p59_p4 = pnand %p58_p3, %p52_p0 }
   0xa   :  { %62 = shalt.err (!%p59_p4)
}
   0xb   :  { %17 = dma.hbm_to_vmem [thread:$0]  %s106_s0, 128, %s15_s7, [#allocation3]  }
   0xc   :  { %83 = dma.done.wait [#allocation3], 128  }
   0xd   :  { %84 = vsyncadd [#allocation3], 4294967168  ;;  %v21_v0 = vld [vmem:[#allocation2] sm:$0xff]  ;;  %s88_s11 = smov 1   ;;  %s89_s12 = smov [#allocation5]  }
   0xe   :  { %22 = vrot.lane.b32.xlu0 %v21_v0, %s88_s11  ;;  %s31_s13 = sshll.u32 %s89_s12, 4  ;;  %s32_s13 = int_to_ptr.vmem [resolvable:$true] %s31_s13 }
   0xf   :  { %s63_s14 = scalar_lea.vmem %s32_s13, 128  ;;  %p68_p6 = scmp.lt.s32.totalorder %s32_s13, %s32_s13 }
  0x10   :  { %p64_p5 = scmp.ne.s32.totalorder %s32_s13, %s63_s14  ;;  %p69_p7 = scmp.lt.s32.totalorder %s63_s14, %s63_s14 }
  0x12   :  { %p70_p8 = por %p69_p7, %p68_p6 }
  0x14   :  { %p71_p9 = pnand %p70_p8, %p64_p5 }
  0x80   :  { %v23_v1 = vpop.permute.xlu0 %22 }
  0x81   :  { %24 = vst [vmem:[#allocation5] sm:$0xff] %v23_v1 }
  0x82   :  { %74 = shalt.err (!%p71_p9)
}
  0x83   :  { %34 = dma.vmem_to_hbm [thread:$0]  %s32_s13, 128, %s107_s1, [#allocation4]  }
  0x84   :  { %85 = dma.done.wait [#allocation4], 128  }
  0x85   :  { %86 = vsyncadd [#allocation4], 4294967168 }
  0x86   :  { %38 = vsyncpa [#allocation3], 1 }
  0x87   :  { %39 = vsyncpa [#allocation4], 1 }

// kernel: tpu_custom_call.1
= control target key start
LH: loop header
LB: loop body
LE: loop exit
PB: predicated region body
PF: predicated region fallthrough
CT: control target
= control target key end

     0   :  { %20 = vsyncpa [#allocation4], 0  ;;  %s1843_s0 = inlined_call_operand.<no memory space> [shape: f32[1], index: 0, kind: input, shape index: {}]   ;;  %s1844_s1 = inlined_call_operand.vmem [shape: f32[8,512], index: 1, kind: input, shape index: {}]   ;;  %s1845_s2 = inlined_call_operand.hbm [shape: f32[9,512], index: 2, kind: input, shape index: {}]   ;;  %s1846_s3 = inlined_call_operand.vmem [shape: bf16[12,72], index: 3, kind: input, shape index: {}]   ;;  %s1847_s4 = inlined_call_operand.vmem [shape: f32[12,1], index: 4, kind: input, shape index: {}]   ;;  %s1848_s5 = inlined_call_operand.vmem [shape: bf16[12,12], index: 5, kind: input, shape index: {}]   ;;  %s1849_s6 = inlined_call_operand.vmem [shape: f32[12,1], index: 6, kind: input, shape index: {}]   ;;  %s1850_s7 = inlined_call_operand.vmem [shape: bf16[4,72], index: 7, kind: input, shape index: {}]   ;;  %s1851_s8 = inlined_call_operand.vmem [shape: f32[4,1], index: 8, kind: input, shape index: {}]   ;;  %s1852_s9 = inlined_call_operand.vmem [shape: f32[4,1], index: 9, kind: input, shape index: {}]   ;;  %s1853_s10 = inlined_call_operand.vmem [shape: f32[4,1], index: 10, kind: input, shape index: {}]   ;;  %s1854_s11 = inlined_call_operand.hbm [shape: f32[4,512], index: 11, kind: output, shape index: {0}]   ;;  %s1855_s12 = inlined_call_operand.hbm [shape: f32[12,512], index: 12, kind: output, shape index: {1}]   ;;  %s1856_s13 = inlined_call_operand.hbm [shape: f32[4,512], index: 13, kind: output, shape index: {2}]  }
   0x1   :  { %21 = vsyncpa [#allocation5], 0 }
   0x2   :  { %22 = vsyncpa [#allocation8], 0  ;;  %s1216_s25 = smov [#allocation3]  }
   0x3   :  { %s32_s26 = sshll.u32 %s1216_s25, 4  ;;  %s33_s26 = int_to_ptr.vmem [resolvable:$true] %s32_s26 }
   0x4   :  { %s1138_s27 = scalar_lea.vmem %s33_s26, 1024  ;;  %p1143_p1 = scmp.lt.s32.totalorder %s33_s26, %s33_s26 }
   0x5   :  { %p1139_p0 = scmp.ne.s32.totalorder %s33_s26, %s1138_s27  ;;  %p1144_p2 = scmp.lt.s32.totalorder %s1138_s27, %s1138_s27 }
   0x7   :  { %p1145_p3 = por %p1144_p2, %p1143_p1 }
   0x9   :  { %p1146_p4 = pnand %p1145_p3, %p1139_p0 }
   0xb   :  { %1149 = shalt.err (!%p1146_p4)
}
   0xc   :  { %s1217_s28 = smov 512   ;;  %s1218_s29 = smov 32  }
   0xd   :  { %38 = dma.hbm_to_vmem [thread:$0]  %s1845_s2, 1024, %s33_s26, [#allocation4], %s1217_s28, %s1217_s28, %s1218_s29  }
   0xe   :  { %1210 = dma.done.wait [#allocation4], 1024  }
   0xf   :  { %1211 = vsyncadd [#allocation4], 4294966272  ;;  %v1310_v0 = vstv %s1843_s0  ;;  %v62_v1 = vld [vmem:[%s1844_s1 + $0x10] sm:$0xff]  ;;  %v60_v2 = vld [vmem:[%s1844_s1] sm:$0xff]  ;;  %s1219_s23 = smov 111   ;;  %s1220_s24 = smov 113   ;;  %v107_v25 = vlaneseq }
  0x10   :  { %v63_v3 = vld [vmem:[%s1844_s1 + $0x18] sm:$0xff]  ;;  %vm74_vm0 = vcmp.ge.f32.partialorder %v62_v1, 0.0  ;;  %v79_v4 = vmul.f32 %v1310_v0, %v62_v1  ;;  %vm72_vm1 = vcmp.ge.f32.partialorder %v60_v2, 0.0  ;;  %v77_v5 = vmul.f32 %v1310_v0, %v60_v2  ;;  %v61_v6 = vld [vmem:[%s1844_s1 + $0x8] sm:$0xff]  ;;  %s1221_s25 = smov 112   ;;  %s1222_s26 = smov 127  }
  0x11   :  { %vm75_vm2 = vcmp.ge.f32.partialorder %v63_v3, 0.0  ;;  %v80_v7 = vmul.f32 %v1310_v0, %v63_v3  ;;  %vm73_vm3 = vcmp.ge.f32.partialorder %v61_v6, 0.0  ;;  %v78_v8 = vmul.f32 %v1310_v0, %v61_v6  ;;  %s1223_s27 = smov 15   ;;  %s1224_s30 = smov 1   ;;  %v415_v14 = vld [vmem:[%s1847_s4] sm:$0xff]  ;;  %v1435_v45 = vld [vmem:[#allocation3 + $0x18] sm:$0xff] }
  0x12   :  { %v1328_v9 = vsel %vm74_vm0, %v62_v1, %v79_v4  ;;  %v1330_v10 = vsel %vm72_vm1, %v60_v2, %v77_v5  ;;  %s1225_s14 = smov 17   ;;  %v1226_v13 = vmov 0   ;;  %s1227_s15 = smov 16   ;;  %v416_v15 = vld [vmem:[%s1847_s4 + $0x8] sm:$0xf]  ;;  %v573_v16 = vld [vmem:[%s1849_s6] sm:$0xff] }
  0x13   :  { %359 = vrot.lane.b32.xlu1 %v1328_v9, %s1219_s23  ;;  %355 = vrot.lane.b32.xlu0 %v1330_v10, %s1219_s23  ;;  %v1336_v11 = vsel %vm75_vm2, %v63_v3, %v80_v7  ;;  %v1338_v12 = vsel %vm73_vm3, %v61_v6, %v78_v8  ;;  %v1413_v19 = vld [vmem:[#allocation3 + $0x30] ss:$0 sm:$0xff]  ;;  %vm363_vm4 = vcmask 908288   ;;  %v1415_v20 = vld [vmem:[#allocation3 + $0x20] ss:$0 sm:$0xff]  ;;  %vm436_vm5 = vcmask 1043456  }
  0x14   :  { %481 = vmatprep.mubr.bf16.mxu0 %v1226_v13  ;;  %524 = vmatprep.mubr.bf16.mxu1 %v1226_v13  ;;  %v1417_v21 = vld [vmem:[#allocation3 + $0x28] ss:$0 sm:$0xff]  ;;  %v1419_v22 = vld [vmem:[#allocation3 + $0x38] ss:$0 sm:$0xff]  ;;  %v1429_v40 = vshrl.u32 %v107_v25, 7  ;;  %v1441_v49 = vld [vmem:[#allocation3 + $0x10] sm:$0xff] }
  0x15   :  { %1122 = vset.pattern.permute.xlu0 %v1226_v13  ;;  %1123 = vset.pattern.permute.xlu1 %v1226_v13  ;;  %v1437_v46 = vld [vmem:[#allocation3 + $0x8] sm:$0xff]  ;;  %vm325_vm6 = vcmask 916480   ;;  %v1443_v50 = vld [vmem:[#allocation3] sm:$0xff]  ;;  %vm287_vm7 = vcmask 924672   ;;  %vm249_vm8 = vcmask 1039360   ;;  %vm212_vm9 = vcmask 7168  }
  0x16   :  { %v337_v47 = vsub.s32 7, %v1429_v40  ;;  %v299_v48 = vsub.s32 6, %v1429_v40  ;;  %v261_v7 = vsub.s32 5, %v1429_v40  ;;  %vm174_vm10 = vcmask 121856  }
  0x17   :  { %361 = vrot.lane.b32.xlu1 %v1336_v11, %s1219_s23  ;;  %357 = vrot.lane.b32.xlu0 %v1338_v12, %s1219_s23  ;;  %vm1858_vm11 = vcmask 130048   ;;  %vm1859_vm12 = vcmask 138240   ;;  %vm1857_vm13 = vcmask 588800   ;;  %vm594_vm1 = vcmask 1045504  }
  0x18   :  { %v1446_v51 = vrot.slane %v1435_v45, %v299_v48  ;;  %v1449_v52 = vrot.slane %v1437_v46, %v299_v48  ;;  %v1453_v56 = vrot.slane %v1441_v49, %v299_v48  ;;  %v1457_v58 = vrot.slane %v1443_v50, %v337_v47 }
  0x19   :  { %v1461_v60 = vrot.slane %v1435_v45, %v337_v47  ;;  %v1464_v61 = vrot.slane %v1437_v46, %v337_v47  ;;  %v1467_v62 = vrot.slane %v1441_v49, %v337_v47  ;;  %v1470_v63 = vrot.slane %v1443_v50, %v299_v48 }
  0x1b   :  { %281 = vrot.lane.b32.xlu1 %v1338_v12, %s1220_s24  ;;  %279 = vrot.lane.b32.xlu0 %v1330_v10, %s1220_s24 }
  0x1f   :  { %285 = vrot.lane.b32.xlu1 %v1336_v11, %s1220_s24  ;;  %283 = vrot.lane.b32.xlu0 %v1328_v9, %s1220_s24 }
  0x23   :  { %319 = vrot.lane.b32.xlu1 %v1338_v12, %s1221_s25  ;;  %317 = vrot.lane.b32.xlu0 %v1330_v10, %s1221_s25 }
  0x27   :  { %323 = vrot.lane.b32.xlu1 %v1336_v11, %s1221_s25  ;;  %321 = vrot.lane.b32.xlu0 %v1328_v9, %s1221_s25 }
  0x2b   :  { %243 = vrot.lane.b32.xlu1 %v1338_v12, %s1222_s26  ;;  %241 = vrot.lane.b32.xlu0 %v1330_v10, %s1222_s26 }
  0x2f   :  { %247 = vrot.lane.b32.xlu1 %v1336_v11, %s1222_s26  ;;  %245 = vrot.lane.b32.xlu0 %v1328_v9, %s1222_s26 }
  0x33   :  { %168 = vrot.lane.b32.xlu1 %v1330_v10, %s1223_s27  ;;  %165 = vrot.lane.b32.xlu0 %v1336_v11, %s1223_s27 }
  0x37   :  { %172 = vrot.lane.b32.xlu1 %v1328_v9, %s1223_s27  ;;  %170 = vrot.lane.b32.xlu0 %v1338_v12, %s1223_s27 }
  0x3b   :  { %206 = vrot.lane.b32.xlu1 %v1330_v10, %s1224_s30  ;;  %203 = vrot.lane.b32.xlu0 %v1336_v11, %s1224_s30 }
  0x3f   :  { %210 = vrot.lane.b32.xlu1 %v1328_v9, %s1224_s30  ;;  %208 = vrot.lane.b32.xlu0 %v1338_v12, %s1224_s30 }
  0x43   :  { %92 = vrot.lane.b32.xlu1 %v1330_v10, %s1225_s14  ;;  %86 = vrot.lane.b32.xlu0 %v1336_v11, %s1225_s14 }
  0x47   :  { %96 = vrot.lane.b32.xlu1 %v1328_v9, %s1225_s14  ;;  %94 = vrot.lane.b32.xlu0 %v1338_v12, %s1225_s14 }
  0x4b   :  { %130 = vrot.lane.b32.xlu1 %v1330_v10, %s1227_s15  ;;  %127 = vrot.lane.b32.xlu0 %v1336_v11, %s1227_s15 }
  0x4f   :  { %134 = vrot.lane.b32.xlu1 %v1328_v9, %s1227_s15  ;;  %132 = vrot.lane.b32.xlu0 %v1338_v12, %s1227_s15 }
  0x53   :  { %419 = vperm.xlu0 %1122, %v415_v14   ;;  %424 = vperm.xlu1 %1123, %v416_v15  }
  0x57   :  { %577 = vperm.xlu1 %1123, %v573_v16  }
  0x85   :  { %v360_v17 = vpop.permute.xlu1 %359  ;;  %v356_v18 = vpop.permute.xlu0 %355 }
  0x89   :  { %v362_v23 = vpop.permute.xlu1 %361  ;;  %v358_v24 = vpop.permute.xlu0 %357 }
  0x8a   :  { %v366_v26 = vsel %vm363_vm4, %v360_v17, %v362_v23  ;;  %v372_v27 = vsel %vm363_vm4, %v362_v23, %v356_v18  ;;  %v364_v28 = vsel %vm363_vm4, %v356_v18, %v358_v24  ;;  %v365_v29 = vsel %vm363_vm4, %v358_v24, %v360_v17 }
  0x8b   :  { %v391_v30 = vmul.f32 %v1413_v19, %v366_v26  ;;  %v389_v31 = vmul.f32 %v1415_v20, %v364_v28  ;;  %v390_v32 = vmul.f32 %v1417_v21, %v365_v29  ;;  %v392_v33 = vmul.f32 %v1419_v22, %v372_v27 }
  0x8d   :  { %v282_v34 = vpop.permute.xlu1 %281  ;;  %v280_v35 = vpop.permute.xlu0 %279  ;;  %v410_v36 = vpack.c.bf16 %v390_v32, %v390_v32  ;;  %v412_v37 = vpack.c.bf16 %v392_v33, %v392_v33  ;;  %v409_v38 = vpack.c.bf16 %v389_v31, %v389_v31  ;;  %v411_v39 = vpack.c.bf16 %v391_v30, %v391_v30 }
  0x8e   :  { %v288_v2 = vsel %vm287_vm7, %v280_v35, %v282_v34  ;;  %v1487_v31 = vrot.slane %v1443_v50, %v261_v7  ;;  %v1490_v33 = vrot.slane %v1435_v45, %v261_v7 }
  0x8f   :  { %1094 = vmatprep.subr.msk.bf16.mxu0 %vm436_vm5, %v410_v36  ;;  %1096 = vmatprep.subr.msk.bf16.mxu1 %vm436_vm5, %v412_v37  ;;  %v438_v41 = vsel %vm436_vm5, %v409_v38, 0  ;;  %v444_v42 = vsel %vm436_vm5, %v411_v39, 0  ;;  %v313_v25 = vmul.f32 %v1470_v63, %v288_v2  ;;  %v1497_v36 = vrot.slane %v1441_v49, %v261_v7 }
  0x90   :  { %456 = vmatpush1.bf16.msra.mxu0 %v438_v41  ;;  %499 = vmatpush1.bf16.msra.mxu1 %v444_v42 }
  0x91   :  { %v286_v43 = vpop.permute.xlu1 %285  ;;  %v284_v44 = vpop.permute.xlu0 %283 }
  0x92   :  { %v296_v55 = vsel %vm287_vm7, %v286_v43, %v280_v35  ;;  %v289_v57 = vsel %vm287_vm7, %v282_v34, %v284_v44  ;;  %v290_v1 = vsel %vm287_vm7, %v284_v44, %v286_v43  ;;  %v1494_v35 = vrot.slane %v1437_v46, %v261_v7 }
  0x93   :  { %v316_v3 = vmul.f32 %v1446_v51, %v296_v55  ;;  %v314_v4 = vmul.f32 %v1449_v52, %v289_v57  ;;  %v315_v17 = vmul.f32 %v1453_v56, %v290_v1 }
  0x95   :  { %v320_v53 = vpop.permute.xlu1 %319  ;;  %v318_v54 = vpop.permute.xlu0 %317 }
  0x96   :  { %v326_v59 = vsel %vm325_vm6, %v318_v54, %v320_v53 }
  0x97   :  { %v351_v8 = vmul.f32 %v1457_v58, %v326_v59 }
  0x99   :  { %v324_v5 = vpop.permute.xlu1 %323  ;;  %v322_v6 = vpop.permute.xlu0 %321  ;;  %v405_v32 = vpack.c.bf16 %v351_v8, %v313_v25 }
  0x9a   :  { %v334_v14 = vsel %vm325_vm6, %v324_v5, %v318_v54  ;;  %v327_v15 = vsel %vm325_vm6, %v320_v53, %v322_v6  ;;  %v328_v16 = vsel %vm325_vm6, %v322_v6, %v324_v5  ;;  %v185_v5 = vsub.s32 2, %v1429_v40 }
  0x9b   :  { %v354_v18 = vmul.f32 %v1461_v60, %v334_v14  ;;  %v352_v23 = vmul.f32 %v1464_v61, %v327_v15  ;;  %v353_v24 = vmul.f32 %v1467_v62, %v328_v16 }
  0x9c   :  { %v1520_v7 = vrot.slane %v1441_v49, %v185_v5 }
  0x9d   :  { %v244_v26 = vpop.permute.xlu1 %243  ;;  %v242_v27 = vpop.permute.xlu0 %241  ;;  %v406_v28 = vpack.c.bf16 %v352_v23, %v314_v4  ;;  %v408_v29 = vpack.c.bf16 %v354_v18, %v316_v3  ;;  %v407_v30 = vpack.c.bf16 %v353_v24, %v315_v17  ;;  %v223_v4 = vsub.s32 3, %v1429_v40 }
  0x9e   :  { %v250_v34 = vsel %vm249_vm8, %v242_v27, %v244_v26  ;;  %v1537_v23 = vrot.slane %v1443_v50, %v185_v5 }
  0x9f   :  { %457 = vmatprep.subr.bf16.mxu0 %v406_v28  ;;  %500 = vmatprep.subr.bf16.mxu1 %v408_v29  ;;  %v275_v39 = vmul.f32 %v1487_v31, %v250_v34  ;;  %v1524_v14 = vrot.slane %v1443_v50, %v223_v4  ;;  %v1528_v16 = vrot.slane %v1435_v45, %v223_v4 }
  0xa0   :  { %458 = vmatpush1.bf16.msra.mxu0 %v405_v32  ;;  %501 = vmatpush1.bf16.msra.mxu1 %v407_v30  ;;  %v1531_v17 = vrot.slane %v1437_v46, %v223_v4  ;;  %v1534_v18 = vrot.slane %v1441_v49, %v223_v4 }
  0xa1   :  { %v248_v37 = vpop.permute.xlu1 %247  ;;  %v246_v38 = vpop.permute.xlu0 %245  ;;  %v401_v1 = vpack.c.bf16 %v275_v39, %v1330_v10 }
  0xa2   :  { %v258_v41 = vsel %vm249_vm8, %v248_v37, %v242_v27  ;;  %v251_v42 = vsel %vm249_vm8, %v244_v26, %v246_v38  ;;  %v252_v43 = vsel %vm249_vm8, %v246_v38, %v248_v37 }
  0xa3   :  { %v278_v44 = vmul.f32 %v1490_v33, %v258_v41  ;;  %v276_v47 = vmul.f32 %v1494_v35, %v251_v42  ;;  %v277_v48 = vmul.f32 %v1497_v36, %v252_v43 }
  0xa5   :  { %v169_v53 = vpop.permute.xlu1 %168  ;;  %v166_v54 = vpop.permute.xlu0 %165  ;;  %v402_v55 = vpack.c.bf16 %v276_v47, %v1338_v12  ;;  %v404_v57 = vpack.c.bf16 %v278_v44, %v1336_v11  ;;  %v403_v59 = vpack.c.bf16 %v277_v48, %v1328_v9  ;;  %v1513_v12 = vrot.slane %v1435_v45, %v185_v5 }
  0xa6   :  { %v1516_v11 = vrot.slane %v1437_v46, %v185_v5  ;;  %v182_v25 = vsel %vm174_vm10, %v166_v54, %v169_v53 }
  0xa7   :  { %459 = vmatprep.subr.bf16.mxu0 %v402_v55  ;;  %502 = vmatprep.subr.bf16.mxu1 %v404_v57  ;;  %v199_v43 = vmul.f32 %v1537_v23, %v182_v25 }
  0xa8   :  { %460 = vmatpush1.bf16.msra.mxu0 %v401_v1  ;;  %503 = vmatpush1.bf16.msra.mxu1 %v403_v59  ;;  %v147_v1 = vsub.s32 1, %v1429_v40 }
  0xa9   :  { %v173_v2 = vpop.permute.xlu1 %172  ;;  %v171_v3 = vpop.permute.xlu0 %170 }
  0xaa   :  { %v177_v6 = vsel %vm174_vm10, %v173_v2, %v166_v54  ;;  %v175_v8 = vsel %vm174_vm10, %v169_v53, %v171_v3  ;;  %v176_v24 = vsel %vm174_vm10, %v171_v3, %v173_v2  ;;  %v109_v2 = vsub.s32 0, %v1429_v40 }
  0xab   :  { %v202_v26 = vmul.f32 %v1513_v12, %v177_v6  ;;  %v200_v27 = vmul.f32 %v1516_v11, %v175_v8  ;;  %v201_v38 = vmul.f32 %v1520_v7, %v176_v24  ;;  %v1570_v24 = vrot.slane %v1435_v45, %v147_v1 }
  0xac   :  { %v1555_v3 = vrot.slane %v1435_v45, %v109_v2  ;;  %v1558_v4 = vrot.slane %v1437_v46, %v109_v2  ;;  %v1562_v6 = vrot.slane %v1441_v49, %v109_v2  ;;  %v1573_v25 = vrot.slane %v1437_v46, %v147_v1 }
  0xad   :  { %v207_v9 = vpop.permute.xlu1 %206  ;;  %v204_v10 = vpop.permute.xlu0 %203 }
  0xae   :  { %v220_v15 = vsel %vm212_vm9, %v204_v10, %v207_v9 }
  0xaf   :  { %v237_v30 = vmul.f32 %v1524_v14, %v220_v15  ;;  %v1566_v15 = vrot.slane %v1443_v50, %v147_v1 }
  0xb1   :  { %v211_v28 = vpop.permute.xlu1 %210  ;;  %v209_v29 = vpop.permute.xlu0 %208  ;;  %v397_v55 = vpack.c.bf16 %v237_v30, %v199_v43 }
  0xb2   :  { %v215_v32 = vsel %vm212_vm9, %v211_v28, %v204_v10  ;;  %v213_v34 = vsel %vm212_vm9, %v207_v9, %v209_v29  ;;  %v214_v37 = vsel %vm212_vm9, %v209_v29, %v211_v28 }
  0xb3   :  { %v240_v39 = vmul.f32 %v1528_v16, %v215_v32  ;;  %v238_v41 = vmul.f32 %v1531_v17, %v213_v34  ;;  %v239_v42 = vmul.f32 %v1534_v18, %v214_v37 }
  0xb5   :  { %v93_v44 = vpop.permute.xlu1 %92  ;;  %v87_v47 = vpop.permute.xlu0 %86  ;;  %v398_v48 = vpack.c.bf16 %v238_v41, %v200_v27  ;;  %v400_v53 = vpack.c.bf16 %v240_v39, %v202_v26  ;;  %v399_v54 = vpack.c.bf16 %v239_v42, %v201_v38  ;;  %v1576_v26 = vrot.slane %v1441_v49, %v147_v1 }
  0xb6   :  { %v1579_v27 = vrot.slane %v1443_v50, %v109_v2  ;;  %v106_v29 = vsel %vm1859_vm12, %v87_v47, %v93_v44 }
  0xb7   :  { %461 = vmatprep.subr.bf16.mxu0 %v398_v48  ;;  %504 = vmatprep.subr.bf16.mxu1 %v400_v53 }
  0xb8   :  { %462 = vmatpush1.bf16.msra.mxu0 %v397_v55  ;;  %505 = vmatpush1.bf16.msra.mxu1 %v399_v54  ;;  %v123_v43 = vmul.f32 %v1579_v27, %v106_v29  ;;  %v1124_v54 = vld [vmem:[%s1846_s3] sm:$0x3f]  }
  0xb9   :  { %v97_v57 = vpop.permute.xlu1 %96  ;;  %v95_v59 = vpop.permute.xlu0 %94 }
  0xba   :  { %v101_v10 = vsel %vm1859_vm12, %v97_v57, %v87_v47  ;;  %v99_v8 = vsel %vm1859_vm12, %v93_v44, %v95_v59  ;;  %v100_v28 = vsel %vm1859_vm12, %v95_v59, %v97_v57 }
  0xbb   :  { %v126_v30 = vmul.f32 %v1555_v3, %v101_v10  ;;  %v124_v32 = vmul.f32 %v1558_v4, %v99_v8  ;;  %v125_v50 = vmul.f32 %v1562_v6, %v100_v28 }
  0xbd   :  { %v131_v5 = vpop.permute.xlu1 %130  ;;  %v128_v9 = vpop.permute.xlu0 %127 }
  0xbe   :  { %v144_v40 = vsel %vm1858_vm11, %v128_v9, %v131_v5 }
  0xbf   :  { %v161_v37 = vmul.f32 %v1566_v15, %v144_v40 }
  0xc1   :  { %v135_v34 = vpop.permute.xlu1 %134  ;;  %v133_v45 = vpop.permute.xlu0 %132  ;;  %v393_v53 = vpack.c.bf16 %v161_v37, %v123_v43 }
  0xc2   :  { %v139_v46 = vsel %vm1858_vm11, %v135_v34, %v128_v9  ;;  %v137_v49 = vsel %vm1858_vm11, %v131_v5, %v133_v45  ;;  %v138_v38 = vsel %vm1858_vm11, %v133_v45, %v135_v34 }
  0xc3   :  { %v164_v39 = vmul.f32 %v1570_v24, %v139_v46  ;;  %v162_v41 = vmul.f32 %v1573_v25, %v137_v49  ;;  %v163_v42 = vmul.f32 %v1576_v26, %v138_v38 }
  0xc5   :  { %v394_v44 = vpack.c.bf16 %v162_v41, %v124_v32  ;;  %v396_v47 = vpack.c.bf16 %v164_v39, %v126_v30  ;;  %v395_v48 = vpack.c.bf16 %v163_v42, %v125_v50 }
  0xc7   :  { %463 = vmatprep.subr.bf16.mxu0 %v394_v44  ;;  %506 = vmatprep.subr.bf16.mxu1 %v396_v47 }
  0xc8   :  { %464 = vmatpush1.bf16.msra.mxu0 %v393_v53  ;;  %507 = vmatpush1.bf16.msra.mxu1 %v395_v48 }
  0xcb   :  { %1095 = vmatmul.mubr.msk.bf16.vlgmr.msra.gmra.mxu0 %vm1857_vm13, %v1124_v54  ;;  %1097 = vmatmul.mubr.msk.bf16.vlgmr.msra.gmra.mxu1 %vm1857_vm13, %v1124_v54 }
  0xcc   :  { %639 = vmatprep.mubr.bf16.mxu0 %v1226_v13  ;;  %682 = vmatprep.mubr.bf16.mxu1 %v1226_v13 }
  0xce   :  { %v420_v55 = vpop.permute.xlu0 %419  ;;  %v425_v32 = vpop.permute.xlu1 %424 }
 0x18b   :  { %v483_v57 = vpop.f32.mrf.mxu0  ;;  %v526_v59 = vpop.f32.mrf.mxu1 }
 0x18c   :  { %v484_v1 = vadd.f32 %v483_v57, %v420_v55  ;;  %v527_v2 = vadd.f32 %v526_v59, %v420_v55 }
 0x18d   :  { %v485_v5 = vpop.f32.mrf.mxu0  ;;  %v528_v9 = vpop.f32.mrf.mxu1 }
 0x18e   :  { %535 = vst [vmem:[#allocation7] sm:$0xff] %v484_v1  ;;  %537 = vst [vmem:[#allocation7 + $0x10] sm:$0xff] %v527_v2  ;;  %v486_v10 = vadd.f32 %v485_v5, %v420_v55  ;;  %v529_v8 = vadd.f32 %v528_v9, %v420_v55  ;;  %v551_v40 = vmul.f32 %v484_v1, %v1310_v0  ;;  %vm543_vm14 = vcmp.ge.f32.partialorder %v484_v1, 0.0 }
 0x18f   :  { %v487_v28 = vpop.f32.mrf.mxu0  ;;  %v530_v29 = vpop.f32.mrf.mxu1  ;;  %vm545_vm15 = vcmp.ge.f32.partialorder %v527_v2, 0.0  ;;  %v553_v30 = vmul.f32 %v527_v2, %v1310_v0 }
 0x190   :  { %536 = vst [vmem:[#allocation7 + $0x8] sm:$0xff] %v486_v10  ;;  %vm544_vm0 = vcmp.ge.f32.partialorder %v486_v10, 0.0  ;;  %v552_v34 = vmul.f32 %v486_v10, %v1310_v0  ;;  %538 = vst [vmem:[#allocation7 + $0x18] sm:$0xff] %v529_v8  ;;  %vm546_vm2 = vcmp.ge.f32.partialorder %v529_v8, 0.0  ;;  %v554_v45 = vmul.f32 %v529_v8, %v1310_v0 }
 0x191   :  { %v488_v37 = vadd.f32 %v487_v28, %v425_v32  ;;  %v531_v46 = vadd.f32 %v530_v29, %v425_v32  ;;  %v489_v49 = vpop.f32.mrf.mxu0  ;;  %v532_v38 = vpop.f32.mrf.mxu1  ;;  %v559_v41 = vsel %vm543_vm14, %v484_v1, %v551_v40  ;;  %v561_v42 = vsel %vm545_vm15, %v527_v2, %v553_v30 }
 0x192   :  { %v490_v50 = vadd.f32 %v489_v49, %v425_v32  ;;  %v533_v39 = vadd.f32 %v532_v38, %v425_v32  ;;  %v560_v53 = vsel %vm544_vm0, %v486_v10, %v552_v34  ;;  %v562_v54 = vsel %vm546_vm2, %v529_v8, %v554_v45  ;;  %v1125_v10 = vld [vmem:[%s1848_s5] sm:$0x3f]   ;;  %v578_v8 = vpop.permute.xlu1 %577 }
 0x193   :  { %539 = vst [vmem:[#allocation7 + $0x20] sm:$0xf] %v488_v37  ;;  %vm547_vm3 = vcmp.ge.f32.partialorder %v488_v37, 0.0  ;;  %v555_v43 = vmul.f32 %v488_v37, %v1310_v0  ;;  %541 = vst [vmem:[#allocation7 + $0x30] sm:$0xf] %v531_v46  ;;  %vm549_vm13 = vcmp.ge.f32.partialorder %v531_v46, 0.0  ;;  %v557_v44 = vmul.f32 %v531_v46, %v1310_v0 }
 0x194   :  { %540 = vst [vmem:[#allocation7 + $0x28] sm:$0xf] %v490_v50  ;;  %vm548_vm11 = vcmp.ge.f32.partialorder %v490_v50, 0.0  ;;  %v556_v47 = vmul.f32 %v490_v50, %v1310_v0  ;;  %542 = vst [vmem:[#allocation7 + $0x38] sm:$0xf] %v533_v39  ;;  %vm550_vm12 = vcmp.ge.f32.partialorder %v533_v39, 0.0  ;;  %v558_v48 = vmul.f32 %v533_v39, %v1310_v0 }
 0x195   :  { %v563_v55 = vsel %vm547_vm3, %v488_v37, %v555_v43  ;;  %v565_v57 = vsel %vm549_vm13, %v531_v46, %v557_v44 }
 0x196   :  { %v564_v59 = vsel %vm548_vm11, %v490_v50, %v556_v47  ;;  %v566_v1 = vsel %vm550_vm12, %v533_v39, %v558_v48  ;;  %v567_v2 = vpack.c.bf16 %v563_v55, %v559_v41  ;;  %v569_v5 = vpack.c.bf16 %v565_v57, %v561_v42  ;;  %v908_v48 = vld [vmem:[%s1851_s8] sm:$0xf] }
 0x197   :  { %v568_v9 = vpack.c.bf16 %v564_v59, %v560_v53  ;;  %v570_v40 = vpack.c.bf16 %v566_v1, %v562_v54  ;;  %vm590_vm11 = vcmask 97280   ;;  %v574_v53 = vld [vmem:[%s1849_s6 + $0x8] sm:$0xf]  ;;  %v1021_v54 = vld [vmem:[%s1853_s10] sm:$0xf] }
 0x198   :  { %v596_v28 = vsel %vm594_vm1, %v567_v2, 0  ;;  %v602_v29 = vsel %vm594_vm1, %v569_v5, 0 }
 0x199   :  { %1099 = vmatprep.subr.msk.bf16.mxu0 %vm594_vm1, %v568_v9  ;;  %1101 = vmatprep.subr.msk.bf16.mxu1 %vm594_vm1, %v570_v40  ;;  %vm1868_vm1 = vcmask 588800  }
 0x19a   :  { %622 = vmatpush1.bf16.msra.mxu0 %v596_v28  ;;  %665 = vmatpush1.bf16.msra.mxu1 %v602_v29  ;;  %vm1869_vm2 = vmmov %vm1868_vm1 }
 0x19d   :  { %1100 = vmatmul.mubr.msk.bf16.vlgmr.msra.gmra.mxu0 %vm590_vm11, %v1125_v10  ;;  %1102 = vmatmul.mubr.msk.bf16.vlgmr.msra.gmra.mxu1 %vm590_vm11, %v1125_v10 }
 0x19e   :  { %961 = vmatprep.mubr.bf16.mxu0 %v1226_v13  ;;  %1002 = vmatprep.mubr.bf16.mxu1 %v1226_v13 }
 0x25d   :  { %v641_v30 = vpop.f32.mrf.mxu0  ;;  %v684_v32 = vpop.f32.mrf.mxu1 }
 0x25e   :  { %v642_v34 = vadd.f32 %v641_v30, %v578_v8  ;;  %v685_v45 = vadd.f32 %v684_v32, %v578_v8 }
 0x25f   :  { %v643_v38 = vpop.f32.mrf.mxu0  ;;  %v686_v39 = vpop.f32.mrf.mxu1 }
 0x260   :  { %vm703_vm12 = vcmp.ge.f32.partialorder %v642_v34, 0.0  ;;  %v707_v37 = vmul.f32 %v642_v34, %v1310_v0  ;;  %v709_v49 = vmul.f32 %v685_v45, %v1310_v0  ;;  %vm705_vm13 = vcmp.ge.f32.partialorder %v685_v45, 0.0 }
 0x261   :  { %v644_v50 = vadd.f32 %v643_v38, %v578_v8  ;;  %v687_v42 = vadd.f32 %v686_v39, %v578_v8 }
 0x262   :  { %v1623_v46 = vsel %vm703_vm12, %v642_v34, %v707_v37  ;;  %v1630_v13 = vsel %vm705_vm13, %v685_v45, %v709_v49 }
 0x263   :  { %764 = vrot.lane.b32.xlu1 %v1623_v46, %s1223_s27  ;;  %866 = vrot.lane.b32.xlu0 %v1623_v46, %s1219_s23  ;;  %v708_v41 = vmul.f32 %v644_v50, %v1310_v0  ;;  %vm704_vm14 = vcmp.ge.f32.partialorder %v644_v50, 0.0  ;;  %v710_v44 = vmul.f32 %v687_v42, %v1310_v0  ;;  %vm706_vm15 = vcmp.ge.f32.partialorder %v687_v42, 0.0  ;;  %v1011_v0 = vld [vmem:[%s1852_s9] sm:$0xf]  ;;  %s1228_s9 = smov [#allocation7]  }
 0x265   :  { %v1653_v43 = vsel %vm704_vm14, %v644_v50, %v708_v41  ;;  %v1660_v47 = vsel %vm706_vm15, %v687_v42, %v710_v44 }
 0x267   :  { %768 = vrot.lane.b32.xlu1 %v1630_v13, %s1223_s27  ;;  %870 = vrot.lane.b32.xlu0 %v1630_v13, %s1219_s23 }
 0x26b   :  { %785 = vrot.lane.b32.xlu1 %v1623_v46, %s1224_s30  ;;  %824 = vrot.lane.b32.xlu0 %v1623_v46, %s1220_s24 }
 0x26f   :  { %789 = vrot.lane.b32.xlu1 %v1630_v13, %s1224_s30  ;;  %828 = vrot.lane.b32.xlu0 %v1630_v13, %s1220_s24 }
 0x273   :  { %722 = vrot.lane.b32.xlu1 %v1623_v46, %s1225_s14  ;;  %845 = vrot.lane.b32.xlu0 %v1623_v46, %s1221_s25 }
 0x277   :  { %726 = vrot.lane.b32.xlu1 %v1630_v13, %s1225_s14  ;;  %849 = vrot.lane.b32.xlu0 %v1630_v13, %s1221_s25 }
 0x27b   :  { %868 = vrot.lane.b32.xlu1 %v1653_v43, %s1219_s23  ;;  %803 = vrot.lane.b32.xlu0 %v1623_v46, %s1222_s26 }
 0x27f   :  { %872 = vrot.lane.b32.xlu1 %v1660_v47, %s1219_s23  ;;  %807 = vrot.lane.b32.xlu0 %v1630_v13, %s1222_s26 }
 0x283   :  { %826 = vrot.lane.b32.xlu1 %v1653_v43, %s1220_s24  ;;  %761 = vrot.lane.b32.xlu0 %v1660_v47, %s1223_s27 }
 0x287   :  { %830 = vrot.lane.b32.xlu1 %v1660_v47, %s1220_s24  ;;  %766 = vrot.lane.b32.xlu0 %v1653_v43, %s1223_s27 }
 0x28b   :  { %847 = vrot.lane.b32.xlu1 %v1653_v43, %s1221_s25  ;;  %782 = vrot.lane.b32.xlu0 %v1660_v47, %s1224_s30 }
 0x28f   :  { %851 = vrot.lane.b32.xlu1 %v1660_v47, %s1221_s25  ;;  %787 = vrot.lane.b32.xlu0 %v1653_v43, %s1224_s30 }
 0x293   :  { %805 = vrot.lane.b32.xlu1 %v1653_v43, %s1222_s26  ;;  %716 = vrot.lane.b32.xlu0 %v1660_v47, %s1225_s14 }
 0x297   :  { %809 = vrot.lane.b32.xlu1 %v1660_v47, %s1222_s26  ;;  %724 = vrot.lane.b32.xlu0 %v1653_v43, %s1225_s14 }
 0x29b   :  { %743 = vrot.lane.b32.xlu1 %v1623_v46, %s1227_s15  ;;  %740 = vrot.lane.b32.xlu0 %v1660_v47, %s1227_s15 }
 0x29f   :  { %747 = vrot.lane.b32.xlu1 %v1630_v13, %s1227_s15  ;;  %745 = vrot.lane.b32.xlu0 %v1653_v43, %s1227_s15 }
 0x2a3   :  { %1014 = vperm.xlu1 %1123, %v1011_v0   ;;  %911 = vperm.xlu0 %1122, %v908_v48  }
 0x2a7   :  { %582 = vperm.xlu1 %1123, %v574_v53   ;;  %1024 = vperm.xlu0 %1122, %v1021_v54  }
 0x2d5   :  { %v1710_v55 = vpop.permute.xlu1 %764  ;;  %v867_v57 = vpop.permute.xlu0 %866 }
 0x2d9   :  { %v1712_v59 = vpop.permute.xlu1 %768  ;;  %v871_v1 = vpop.permute.xlu0 %870 }
 0x2dd   :  { %v1714_v2 = vpop.permute.xlu1 %785  ;;  %v825_v5 = vpop.permute.xlu0 %824 }
 0x2e1   :  { %v1716_v9 = vpop.permute.xlu1 %789  ;;  %v829_v40 = vpop.permute.xlu0 %828 }
 0x2e5   :  { %v1718_v28 = vpop.permute.xlu1 %722  ;;  %v846_v29 = vpop.permute.xlu0 %845 }
 0x2e9   :  { %v1720_v10 = vpop.permute.xlu1 %726  ;;  %v850_v8 = vpop.permute.xlu0 %849 }
 0x2ed   :  { %v869_v30 = vpop.permute.xlu1 %868  ;;  %v1722_v32 = vpop.permute.xlu0 %803 }
 0x2ee   :  { %v874_v34 = vsel %vm363_vm4, %v867_v57, %v869_v30  ;;  %v875_v45 = vsel %vm363_vm4, %v869_v30, %v871_v1 }
 0x2ef   :  { %v883_v37 = vmul.f32 %v1415_v20, %v874_v34  ;;  %v884_v49 = vmul.f32 %v1417_v21, %v875_v45 }
 0x2f1   :  { %v903_v38 = vpack.c.bf16 %v883_v37, %v883_v37  ;;  %v904_v50 = vpack.c.bf16 %v884_v49, %v884_v49  ;;  %v873_v39 = vpop.permute.xlu1 %872  ;;  %v1728_v41 = vpop.permute.xlu0 %807 }
 0x2f2   :  { %v876_v42 = vsel %vm363_vm4, %v871_v1, %v873_v39  ;;  %v882_v44 = vsel %vm363_vm4, %v873_v39, %v867_v57  ;;  %vm1860_vm4 = vcmask 138240  }
 0x2f3   :  { %v885_v0 = vmul.f32 %v1413_v19, %v876_v42  ;;  %v886_v48 = vmul.f32 %v1419_v22, %v882_v44  ;;  %1103 = vmatprep.subr.msk.bf16.mxu0 %vm436_vm5, %v904_v50  ;;  %v918_v53 = vsel %vm436_vm5, %v903_v38, 0 }
 0x2f4   :  { %936 = vmatpush1.bf16.msra.mxu0 %v918_v53 }
 0x2f5   :  { %v905_v20 = vpack.c.bf16 %v885_v0, %v885_v0  ;;  %v906_v21 = vpack.c.bf16 %v886_v48, %v886_v48  ;;  %v827_v54 = vpop.permute.xlu1 %826  ;;  %v762_v30 = vpop.permute.xlu0 %761 }
 0x2f6   :  { %v832_v19 = vsel %vm287_vm7, %v825_v5, %v827_v54  ;;  %v833_v22 = vsel %vm287_vm7, %v827_v54, %v829_v40 }
 0x2f7   :  { %1105 = vmatprep.subr.msk.bf16.mxu1 %vm436_vm5, %v906_v21  ;;  %v924_v34 = vsel %vm436_vm5, %v905_v20, 0  ;;  %v841_v50 = vmul.f32 %v832_v19, %v1470_v63  ;;  %v842_v39 = vmul.f32 %v833_v22, %v1449_v52  ;;  %vm1861_vm5 = vmmov %vm1860_vm4 }
 0x2f8   :  { %977 = vmatpush1.bf16.msra.mxu1 %v924_v34 }
 0x2f9   :  { %v831_v1 = vpop.permute.xlu1 %830  ;;  %v767_v57 = vpop.permute.xlu0 %766 }
 0x2fa   :  { %v834_v0 = vsel %vm287_vm7, %v829_v40, %v831_v1  ;;  %v840_v48 = vsel %vm287_vm7, %v831_v1, %v825_v5  ;;  %vm1863_vm7 = vmmov %vm1860_vm4 }
 0x2fb   :  { %v843_v63 = vmul.f32 %v834_v0, %v1453_v56  ;;  %v844_v52 = vmul.f32 %v840_v48, %v1446_v51 }
 0x2fd   :  { %v848_v45 = vpop.permute.xlu1 %847  ;;  %v783_v37 = vpop.permute.xlu0 %782 }
 0x2fe   :  { %v853_v49 = vsel %vm325_vm6, %v846_v29, %v848_v45  ;;  %v854_v38 = vsel %vm325_vm6, %v848_v45, %v850_v8 }
 0x2ff   :  { %v862_v42 = vmul.f32 %v853_v49, %v1457_v58  ;;  %v863_v44 = vmul.f32 %v854_v38, %v1464_v61  ;;  %v772_v38 = vsel %vm174_vm10, %v1712_v59, %v762_v30 }
 0x301   :  { %v899_v53 = vpack.c.bf16 %v862_v42, %v841_v50  ;;  %v852_v20 = vpop.permute.xlu1 %851  ;;  %v788_v21 = vpop.permute.xlu0 %787  ;;  %v900_v54 = vpack.c.bf16 %v863_v44, %v842_v39  ;;  %v793_v50 = vsel %vm212_vm9, %v1716_v9, %v783_v37  ;;  %v777_v39 = vsel %vm174_vm10, %v762_v30, %v1710_v55 }
 0x302   :  { %v855_v34 = vsel %vm325_vm6, %v850_v8, %v852_v20  ;;  %v861_v45 = vsel %vm325_vm6, %v852_v20, %v846_v29  ;;  %v791_v5 = vsel %vm212_vm9, %v1714_v2, %v788_v21  ;;  %v770_v29 = vsel %vm174_vm10, %v1710_v55, %v767_v57 }
 0x303   :  { %v864_v58 = vmul.f32 %v855_v34, %v1467_v62  ;;  %v865_v61 = vmul.f32 %v861_v45, %v1461_v60  ;;  %937 = vmatprep.subr.bf16.mxu0 %v900_v54  ;;  %v798_v60 = vsel %vm212_vm9, %v783_v37, %v1714_v2  ;;  %v800_v62 = vmul.f32 %v791_v5, %v1531_v17 }
 0x304   :  { %938 = vmatpush1.bf16.msra.mxu0 %v899_v53  ;;  %v779_v42 = vmul.f32 %v770_v29, %v1516_v11  ;;  %v792_v0 = vsel %vm212_vm9, %v788_v21, %v1716_v9  ;;  %v802_v55 = vmul.f32 %v793_v50, %v1528_v16  ;;  %v781_v9 = vmul.f32 %v772_v38, %v1513_v12 }
 0x305   :  { %v901_v40 = vpack.c.bf16 %v864_v58, %v843_v63  ;;  %v806_v1 = vpop.permute.xlu1 %805  ;;  %v717_v19 = vpop.permute.xlu0 %716  ;;  %v902_v22 = vpack.c.bf16 %v865_v61, %v844_v52  ;;  %vm1862_vm6 = vcmask 130048  }
 0x306   :  { %v811_v56 = vsel %vm249_vm8, %v1722_v32, %v806_v1  ;;  %v812_v51 = vsel %vm249_vm8, %v806_v1, %v1728_v41  ;;  %v892_v30 = vpack.c.bf16 %v800_v62, %v779_v42  ;;  %v730_v20 = vsel %vm1860_vm4, %v1720_v10, %v717_v19  ;;  %vm1865_vm9 = vmmov %vm1862_vm6 }
 0x307   :  { %v820_v8 = vmul.f32 %v811_v56, %v1487_v31  ;;  %v821_v49 = vmul.f32 %v812_v51, %v1494_v35  ;;  %978 = vmatprep.subr.bf16.mxu1 %v902_v22  ;;  %v799_v35 = vmul.f32 %v798_v60, %v1524_v14  ;;  %v771_v14 = vsel %vm174_vm10, %v767_v57, %v1712_v59  ;;  %vm1866_vm10 = vmmov %vm1862_vm6 }
 0x308   :  { %979 = vmatpush1.bf16.msra.mxu1 %v901_v40  ;;  %v780_v59 = vmul.f32 %v771_v14, %v1520_v7  ;;  %v739_v21 = vmul.f32 %v730_v20, %v1555_v3  ;;  %vm1867_vm0 = vmmov %vm1862_vm6 }
 0x309   :  { %v895_v2 = vpack.c.bf16 %v820_v8, %v1623_v46  ;;  %v810_v17 = vpop.permute.xlu1 %809  ;;  %v725_v44 = vpop.permute.xlu0 %724  ;;  %v896_v31 = vpack.c.bf16 %v821_v49, %v1653_v43  ;;  %v778_v43 = vmul.f32 %v777_v39, %v1537_v23 }
 0x30a   :  { %v813_v37 = vsel %vm249_vm8, %v1728_v41, %v810_v17  ;;  %v819_v48 = vsel %vm249_vm8, %v810_v17, %v1722_v32  ;;  %v801_v41 = vmul.f32 %v792_v0, %v1534_v18  ;;  %v728_v23 = vsel %vm1861_vm5, %v1718_v28, %v725_v44  ;;  %vm1864_vm8 = vmmov %vm1860_vm4 }
 0x30b   :  { %v822_v11 = vmul.f32 %v813_v37, %v1497_v36  ;;  %v823_v46 = vmul.f32 %v819_v48, %v1490_v33  ;;  %939 = vmatprep.subr.bf16.mxu0 %v896_v31  ;;  %v891_v33 = vpack.c.bf16 %v799_v35, %v778_v43  ;;  %v894_v18 = vpack.c.bf16 %v802_v55, %v781_v9 }
 0x30c   :  { %940 = vmatpush1.bf16.msra.mxu0 %v895_v2  ;;  %v893_v57 = vpack.c.bf16 %v801_v41, %v780_v59  ;;  %v737_v54 = vmul.f32 %v728_v23, %v1558_v4 }
 0x30d   :  { %v897_v32 = vpack.c.bf16 %v822_v11, %v1630_v13  ;;  %v744_v53 = vpop.permute.xlu1 %743  ;;  %941 = vmatprep.subr.bf16.mxu0 %v892_v30  ;;  %v741_v16 = vpop.permute.xlu0 %740  ;;  %v898_v36 = vpack.c.bf16 %v823_v46, %v1660_v47  ;;  %v729_v13 = vsel %vm1863_vm7, %v725_v44, %v1720_v10  ;;  %v735_v47 = vsel %vm1864_vm8, %v717_v19, %v1718_v28 }
 0x30e   :  { %v756_v12 = vsel %vm1862_vm6, %v741_v16, %v744_v53  ;;  %v738_v58 = vmul.f32 %v729_v13, %v1562_v6  ;;  %v736_v4 = vmul.f32 %v735_v47, %v1579_v27  ;;  %v907_v6 = vld [vmem:[%s1850_s7] sm:$0x3]  ;;  %s1060_s7 = sshll.u32 %s1228_s9, 4  ;;  %s1061_s7 = int_to_ptr.vmem [resolvable:$true] %s1060_s7 }
 0x30f   :  { %980 = vmatprep.subr.bf16.mxu1 %v898_v36  ;;  %v757_v45 = vmul.f32 %v756_v12, %v1566_v15  ;;  %s1150_s10 = scalar_lea.vmem %s1061_s7, 1024  ;;  %p1155_p6 = scmp.lt.s32.totalorder %s1061_s7, %s1061_s7 }
 0x310   :  { %942 = vmatpush1.bf16.msra.mxu0 %v891_v33  ;;  %981 = vmatpush1.bf16.msra.mxu1 %v897_v32  ;;  %p1151_p5 = scmp.ne.s32.totalorder %s1061_s7, %s1150_s10  ;;  %p1156_p7 = scmp.lt.s32.totalorder %s1150_s10, %s1150_s10 }
 0x311   :  { %v748_v34 = vpop.permute.xlu1 %747  ;;  %982 = vmatprep.subr.bf16.mxu1 %v894_v18  ;;  %v746_v7 = vpop.permute.xlu0 %745  ;;  %v887_v1 = vpack.c.bf16 %v757_v45, %v736_v4 }
 0x312   :  { %v751_v63 = vsel %vm1865_vm9, %v748_v34, %v741_v16  ;;  %v749_v52 = vsel %vm1866_vm10, %v744_v53, %v746_v7  ;;  %v750_v10 = vsel %vm1867_vm0, %v746_v7, %v748_v34  ;;  %p1157_p8 = por %p1156_p7, %p1155_p6 }
 0x313   :  { %v760_v61 = vmul.f32 %v751_v63, %v1570_v24  ;;  %v758_v28 = vmul.f32 %v749_v52, %v1573_v25  ;;  %v759_v3 = vmul.f32 %v750_v10, %v1576_v26  ;;  %v645_v24 = vpop.f32.mrf.mxu0  ;;  %v688_v25 = vpop.f32.mrf.mxu1 }
 0x314   :  { %983 = vmatpush1.bf16.msra.mxu1 %v893_v57  ;;  %p1158_p9 = pnand %p1157_p8, %p1151_p5 }
 0x315   :  { %v889_v5 = vpack.c.bf16 %v759_v3, %v738_v58  ;;  %v888_v40 = vpack.c.bf16 %v758_v28, %v737_v54  ;;  %v890_v15 = vpack.c.bf16 %v760_v61, %v739_v21  ;;  %v647_v27 = vpop.f32.mrf.mxu0  ;;  %v690_v19 = vpop.f32.mrf.mxu1 }
 0x317   :  { %943 = vmatprep.subr.bf16.mxu0 %v888_v40  ;;  %984 = vmatprep.subr.bf16.mxu1 %v890_v15 }
 0x318   :  { %944 = vmatpush1.bf16.msra.mxu0 %v887_v1  ;;  %985 = vmatpush1.bf16.msra.mxu1 %v889_v5 }
 0x31b   :  { %1104 = vmatmul.mubr.msk.bf16.vlgmr.msra.gmra.mxu0 %vm1868_vm1, %v907_v6  ;;  %1106 = vmatmul.mubr.msk.bf16.vlgmr.msra.gmra.mxu1 %vm1869_vm2, %v907_v6 }
 0x31e   :  { %v1015_v26 = vpop.permute.xlu1 %1014 }
 0x322   :  { %v583_v22 = vpop.permute.xlu1 %582 }
 0x323   :  { %v646_v29 = vadd.f32 %v645_v24, %v583_v22  ;;  %v648_v56 = vadd.f32 %v647_v27, %v583_v22  ;;  %v689_v51 = vadd.f32 %v688_v25, %v583_v22  ;;  %v691_v60 = vadd.f32 %v690_v19, %v583_v22 }
 0x325   :  { %v697_v62 = vcombine.low %v646_v29, %v648_v56  ;;  %v698_v8 = vcombine.low %v689_v51, %v691_v60 }
 0x327   :  { %701 = vst [vmem:[#allocation9] sm:$0xff] %v697_v62  ;;  %702 = vst [vmem:[#allocation9 + $0x8] sm:$0xff] %v698_v8 }
 0x328   :  { %1161 = shalt.err (!%p1158_p9)
}
 0x329   :  { %1066 = dma.vmem_to_hbm [thread:$0]  %s1061_s7, 1024, %s1855_s12, [#allocation8], %s1217_s28, %s1217_s28, %s1218_s29  }
 0x32a   :  { %s1229_s16 = smov [#allocation9]  }
 0x32b   :  { %s1073_s17 = sshll.u32 %s1229_s16, 4  ;;  %s1074_s17 = int_to_ptr.vmem [resolvable:$true] %s1073_s17 }
 0x32c   :  { %s1170_s18 = scalar_lea.vmem %s1074_s17, 256  ;;  %p1175_p11 = scmp.lt.s32.totalorder %s1074_s17, %s1074_s17 }
 0x32d   :  { %p1171_p10 = scmp.ne.s32.totalorder %s1074_s17, %s1170_s18  ;;  %p1176_p12 = scmp.lt.s32.totalorder %s1170_s18, %s1170_s18 }
 0x32f   :  { %p1177_p13 = por %p1176_p12, %p1175_p11 }
 0x331   :  { %p1178_p0 = pnand %p1177_p13, %p1171_p10 }
 0x333   :  { %1181 = shalt.err (!%p1178_p0)
}
 0x334   :  { %1076 = dma.vmem_to_hbm [thread:$0]  %s1074_s17, 256, %s1856_s13, [#allocation8]   ;;  %v912_v49 = vpop.permute.xlu0 %911  ;;  %v1126_v53 = vld [vmem:[%s1844_s1] sm:$0xff]  ;;  %v1127_v36 = vld [vmem:[%s1844_s1 + $0x10] sm:$0xff]  ;;  %v1128_v20 = vld [vmem:[%s1844_s1 + $0x8] sm:$0xff] }
 0x335   :  { %s1230_s12 = smov [#allocation6]   ;;  %v1129_v59 = vld [vmem:[%s1844_s1 + $0x18] sm:$0xff] }
 0x336   :  { %s1051_s13 = sshll.u32 %s1230_s12, 4  ;;  %s1052_s13 = int_to_ptr.vmem [resolvable:$true] %s1051_s13 }
 0x337   :  { %s1190_s2 = scalar_lea.vmem %s1052_s13, 256  ;;  %p1195_p2 = scmp.lt.s32.totalorder %s1052_s13, %s1052_s13 }
 0x338   :  { %v1025_v44 = vpop.permute.xlu0 %1024  ;;  %p1191_p1 = scmp.ne.s32.totalorder %s1052_s13, %s1190_s2  ;;  %p1196_p3 = scmp.lt.s32.totalorder %s1190_s2, %s1190_s2 }
 0x33a   :  { %p1197_p4 = por %p1196_p3, %p1195_p2 }
 0x33c   :  { %p1198_p5 = pnand %p1197_p4, %p1191_p1 }
 0x3db   :  { %v963_v38 = vpop.f32.mrf.mxu0  ;;  %v1004_v50 = vpop.f32.mrf.mxu1 }
 0x3dc   :  { %v964_v39 = vadd.f32 %v963_v38, %v912_v49  ;;  %v1005_v42 = vadd.f32 %v1004_v50, %v912_v49 }
 0x3dd   :  { %v965_v2 = vpop.f32.mrf.mxu0  ;;  %v1006_v17 = vpop.f32.mrf.mxu1 }
 0x3de   :  { %v1017_v31 = vmul.f32 %v1015_v26, %v964_v39  ;;  %v1019_v35 = vmul.f32 %v1015_v26, %v1005_v42  ;;  %v966_v0 = vadd.f32 %v965_v2, %v912_v49  ;;  %v1007_v37 = vadd.f32 %v1006_v17, %v912_v49 }
 0x3df   :  { %v967_v48 = vpop.f32.mrf.mxu0  ;;  %v1008_v55 = vpop.f32.mrf.mxu1 }
 0x3e0   :  { %v1027_v11 = vadd.f32 %v1025_v44, %v1017_v31  ;;  %v1029_v46 = vadd.f32 %v1025_v44, %v1019_v35  ;;  %v1018_v30 = vmul.f32 %v1015_v26, %v966_v0  ;;  %v1020_v43 = vmul.f32 %v1015_v26, %v1007_v37 }
 0x3e1   :  { %v968_v14 = vpop.f32.mrf.mxu0  ;;  %v1009_v9 = vpop.f32.mrf.mxu1 }
 0x3e2   :  { %v1028_v41 = vadd.f32 %v1025_v44, %v1018_v30  ;;  %v1030_v32 = vadd.f32 %v1025_v44, %v1020_v43  ;;  %v1031_v16 = vadd.f32 %v1126_v53, %v1027_v11  ;;  %v1033_v33 = vadd.f32 %v1127_v36, %v1029_v46 }
 0x3e4   :  { %v1032_v23 = vadd.f32 %v1128_v20, %v1028_v41  ;;  %v1034_v12 = vadd.f32 %v1129_v59, %v1030_v32 }
 0x3e6   :  { %v1039_v18 = vcombine.low %v1031_v16, %v1032_v23  ;;  %v1040_v13 = vcombine.low %v1033_v33, %v1034_v12 }
 0x3e8   :  { %1043 = vst [vmem:[#allocation6] sm:$0xff] %v1039_v18  ;;  %1044 = vst [vmem:[#allocation6 + $0x8] sm:$0xff] %v1040_v13 }
 0x3e9   :  { %1201 = shalt.err (!%p1198_p5)
}
 0x3ea   :  { %1054 = dma.vmem_to_hbm [thread:$0]  %s1052_s13, 256, %s1854_s11, [#allocation5]  }
 0x3eb   :  { %1212 = dma.done.wait [#allocation5], 256  }
 0x3ec   :  { %1213 = vsyncadd [#allocation5], 4294967040 }
 0x3ed   :  { %1214 = dma.done.wait [#allocation8], 1280  }
 0x3ee   :  { %1215 = vsyncadd [#allocation8], 4294966016 }
 0x3ef   :  { %1086 = vsyncpa [#allocation4], 1 }
 0x3f0   :  { %1087 = vsyncpa [#allocation5], 1 }
 0x3f1   :  { %1088 = vsyncpa [#allocation8], 1 }

</bundles_post_ra>
